<compile_context>
chip_gen: v5e
topology: v5e:2x2
jax: 0.10.0
libtpu: 0.0.40
codegen_flags: <defaults>
</compile_context>

<pallas_src>
import jax
import jax.numpy as jnp
from jax.experimental import pallas as pl
from jax.experimental.pallas import tpu as pltpu

H0, H1, H2 = 512, 256, 64


def _round_up(x, m):
    return (x + m - 1) // m * m


def critic_kernel(x_ref,
                  w0_ref, b0_ref,
                  w1_ref, b1_ref,
                  w2_ref, b2_ref,
                  w3_ref, b3_ref,
                  o_ref):
    """One (tb, fin) batch tile -> (tb, 1) value tile.

    MXU matmuls take bf16 operands with f32 accumulation; bias add + ReLU stay
    f32 on the VPU.  The final 64->1 layer is a VPU multiply + XLU lane-reduce
    against the real (1,64) w3 row (no padded matmul, no wide output slab).
    """
    h = jnp.dot(x_ref[...], w0_ref[...],
                preferred_element_type=jnp.float32) + b0_ref[...]
    h = jnp.maximum(h, 0.0)
    h = jnp.dot(h.astype(jnp.bfloat16), w1_ref[...],
                preferred_element_type=jnp.float32) + b1_ref[...]
    h = jnp.maximum(h, 0.0)
    h = jnp.dot(h.astype(jnp.bfloat16), w2_ref[...],
                preferred_element_type=jnp.float32) + b2_ref[...]
    h = jnp.maximum(h, 0.0)
    v = jnp.sum(h * w3_ref[...], axis=-1, keepdims=True) + b3_ref[...]
    o_ref[...] = v.astype(o_ref.dtype)


def critic_forward(x, kparams, *, block_b=1024):
    """x: (B, input_size) f32; kparams from prepare_kernel_params. Returns (B, 1) f32."""
    B, fin = x.shape

    # Batch tile: as large as block_b allows (amortizes per-step pipeline
    # overhead), multiple of 8, and capped so the grid has >= 2 steps whenever
    # possible so the "parallel" axis can shard across both v7x TensorCores.
    b8 = _round_up(B, 8)
    tb = min(block_b, b8)
    if b8 // tb < 2 and b8 >= 16:
        tb = _round_up(pl.cdiv(b8, 2), 8)
    Bp = _round_up(B, tb)

    # Pre-cast x to bf16 (numerically identical to the in-kernel cast, halves
    # the dominant input DMA stream) and zero-pad batch rows (exact: padded
    # rows are sliced off below).
    xk = x.astype(jnp.bfloat16)
    if Bp != B:
        xk = jnp.pad(xk, ((0, Bp - B), (0, 0)))

    flat = []
    for w, b in kparams:
        flat += [w, b]

    x_spec = pl.BlockSpec((tb, fin), lambda i: (i, 0))
    # Constant index_map -> weights/biases stay resident in VMEM across steps.
    weight_specs = [pl.BlockSpec(a.shape, lambda i: (0, 0)) for a in flat]
    out_spec = pl.BlockSpec((tb, 1), lambda i: (i, 0))

    flops = 2 * Bp * (fin * H0 + H0 * H1 + H1 * H2 + H2 * 1)
    bytes_accessed = (xk.size * xk.dtype.itemsize
                      + Bp * 4
                      + sum(int(a.size) * a.dtype.itemsize for a in flat))

    out = pl.pallas_call(
        critic_kernel,
        out_shape=jax.ShapeDtypeStruct((Bp, 1), jnp.float32),
        grid=(Bp // tb,),
        in_specs=[x_spec] + weight_specs,
        out_specs=out_spec,
        compiler_params=pltpu.CompilerParams(
            dimension_semantics=("parallel",)),
        cost_estimate=pl.CostEstimate(flops=flops, transcendentals=0,
                                      bytes_accessed=bytes_accessed),
    )(xk, *flat)
    return out[:B, :]


def init_params(key, input_size):
    """Deterministic synthetic f32 weights matching nn.Linear shapes (stored transposed)."""
    sizes = [(input_size, H0), (H0, H1), (H1, H2), (H2, 1)]
    params = []
    for i, (fin, fout) in enumerate(sizes):
        kw, kb = jax.random.split(jax.random.fold_in(key, i))
        bound = 1.0 / jnp.sqrt(jnp.float32(fin))
        w = jax.random.uniform(kw, (fin, fout), jnp.float32, -bound, bound)
        b = jax.random.uniform(kb, (1, fout), jnp.float32, -bound, bound)
        params.append((w, b))
    return params


def prepare_kernel_params(params):
    """Kernel-layout params: bf16 (F_in,F_out) weights / f32 (1,F_out) biases for
    the three MXU layers; the final 64->1 layer stays f32 as a (1,64) row + (1,1)
    bias for the VPU/XLU path.  No lane padding anywhere."""
    (w0, b0), (w1, b1), (w2, b2), (w3, b3) = params
    return [
        (w0.astype(jnp.bfloat16), b0.astype(jnp.float32)),
        (w1.astype(jnp.bfloat16), b1.astype(jnp.float32)),
        (w2.astype(jnp.bfloat16), b2.astype(jnp.float32)),
        (w3.reshape(1, H2).astype(jnp.float32),
         b3.reshape(1, 1).astype(jnp.float32)),
    ]


def critic_reference_f32(x, params):
    """Pure-f32 reference matching the PyTorch module."""
    h = x
    for i, (w, b) in enumerate(params):
        h = h @ w + b
        if i < len(params) - 1:
            h = jnp.maximum(h, 0.0)
    return h


def critic_reference_mixed(x, kparams):
    """Plain-JAX reference with the same mixed-precision arithmetic as the kernel."""
    (w0, b0), (w1, b1), (w2, b2), (w3r, b3) = kparams
    h = jnp.dot(x.astype(jnp.bfloat16), w0,
                preferred_element_type=jnp.float32) + b0
    h = jnp.maximum(h, 0.0)
    h = jnp.dot(h.astype(jnp.bfloat16), w1,
                preferred_element_type=jnp.float32) + b1
    h = jnp.maximum(h, 0.0)
    h = jnp.dot(h.astype(jnp.bfloat16), w2,
                preferred_element_type=jnp.float32) + b2
    h = jnp.maximum(h, 0.0)
    return jnp.sum(h * w3r, axis=-1, keepdims=True) + b3


if __name__ == "__main__":
    key = jax.random.PRNGKey(0)
    # LunarLander-v2 observation: input_shape = (8,), so input_size = 8.
    input_size = 8
    batch = 250   # non-multiple-of-8: exercises batch padding + a 2-step grid

    kx, kp = jax.random.split(key)
    x = jax.random.normal(kx, (batch, input_size), dtype=jnp.float32)
    params = init_params(kp, input_size)
    kparams = prepare_kernel_params(params)

    out = critic_forward(x, kparams)
    out = jax.block_until_ready(out)
    assert out.shape == (batch, 1), out.shape

    # Tight check against a reference with identical mixed-precision arithmetic.
    ref_mixed = critic_reference_mixed(x, kparams)
    assert jnp.allclose(out, ref_mixed, atol=1e-4, rtol=1e-4), (
        "mixed-precision mismatch", float(jnp.max(jnp.abs(out - ref_mixed))))

    # Sanity check against the pure-f32 module semantics (bf16 rounding tolerance).
    ref_f32 = critic_reference_f32(x, params)
    assert jnp.allclose(out, ref_f32, atol=5e-2, rtol=5e-2), (
        "f32-reference mismatch", float(jnp.max(jnp.abs(out - ref_f32))))

    print("KERNEL_OK")
</pallas_src>

<mosaic_0001>
module attributes {stable_mosaic.version = 11 : i64} {
  func.func @critic_kernel(%arg0: i32, %arg1: memref<128x8xbf16, #tpu.memory_space<vmem>>, %arg2: memref<8x512xbf16, #tpu.memory_space<vmem>>, %arg3: memref<1x512xf32, #tpu.memory_space<vmem>>, %arg4: memref<512x256xbf16, #tpu.memory_space<vmem>>, %arg5: memref<1x256xf32, #tpu.memory_space<vmem>>, %arg6: memref<256x64xbf16, #tpu.memory_space<vmem>>, %arg7: memref<1x64xf32, #tpu.memory_space<vmem>>, %arg8: memref<1x64xf32, #tpu.memory_space<vmem>>, %arg9: memref<1x1xf32, #tpu.memory_space<vmem>>, %arg10: memref<128x1xf32, #tpu.memory_space<vmem>>) attributes {dimension_semantics = [#tpu.dimension_semantics<parallel>], iteration_bounds = array<i64: 2>, scalar_prefetch = 0 : i64, scratch_operands = 0 : i64, tpu.core_type = #tpu.core_type<tc>, window_params = [{transform_indices = @transform_0, window_bounds = array<i64: 128, 8>}, {pipeline_mode = #tpu.pipeline_mode<synchronous>, transform_indices = @transform_1, window_bounds = array<i64: 8, 512>}, {pipeline_mode = #tpu.pipeline_mode<synchronous>, transform_indices = @transform_2, window_bounds = array<i64: 1, 512>}, {pipeline_mode = #tpu.pipeline_mode<synchronous>, transform_indices = @transform_3, window_bounds = array<i64: 512, 256>}, {pipeline_mode = #tpu.pipeline_mode<synchronous>, transform_indices = @transform_4, window_bounds = array<i64: 1, 256>}, {pipeline_mode = #tpu.pipeline_mode<synchronous>, transform_indices = @transform_5, window_bounds = array<i64: 256, 64>}, {pipeline_mode = #tpu.pipeline_mode<synchronous>, transform_indices = @transform_6, window_bounds = array<i64: 1, 64>}, {pipeline_mode = #tpu.pipeline_mode<synchronous>, transform_indices = @transform_7, window_bounds = array<i64: 1, 64>}, {pipeline_mode = #tpu.pipeline_mode<synchronous>, transform_indices = @transform_8, window_bounds = array<i64: 1, 1>}, {transform_indices = @transform_9, window_bounds = array<i64: 128, 1>}]} {
    %c0 = arith.constant 0 : index
    %c0_0 = arith.constant 0 : index
    %0 = vector.load %arg1[%c0, %c0_0] : memref<128x8xbf16, #tpu.memory_space<vmem>>, vector<128x8xbf16>
    %c0_1 = arith.constant 0 : index
    %c0_2 = arith.constant 0 : index
    %1 = vector.load %arg2[%c0_1, %c0_2] : memref<8x512xbf16, #tpu.memory_space<vmem>>, vector<8x512xbf16>
    %cst = arith.constant dense<0.000000e+00> : vector<128x512xf32>
    %2 = tpu.matmul %0, %1, %cst {dimension_numbers = #tpu.dot_dimension_numbers<[1], [0], [0], [1], [0, 0, 1, 1], [], []>} : vector<128x8xbf16>, vector<8x512xbf16>, vector<128x512xf32> -> vector<128x512xf32>
    %c0_3 = arith.constant 0 : index
    %c0_4 = arith.constant 0 : index
    %3 = vector.load %arg3[%c0_3, %c0_4] : memref<1x512xf32, #tpu.memory_space<vmem>>, vector<1x512xf32>
    %4 = vector.broadcast %3 : vector<1x512xf32> to vector<128x512xf32>
    %5 = arith.addf %2, %4 : vector<128x512xf32>
    %cst_5 = arith.constant 0.000000e+00 : f32
    %6 = vector.broadcast %cst_5 : f32 to vector<128x512xf32>
    %7 = arith.maximumf %5, %6 : vector<128x512xf32>
    %8 = arith.truncf %7 : vector<128x512xf32> to vector<128x512xbf16>
    %c0_6 = arith.constant 0 : index
    %c0_7 = arith.constant 0 : index
    %9 = vector.load %arg4[%c0_6, %c0_7] : memref<512x256xbf16, #tpu.memory_space<vmem>>, vector<512x256xbf16>
    %cst_8 = arith.constant dense<0.000000e+00> : vector<128x256xf32>
    %10 = tpu.matmul %8, %9, %cst_8 {dimension_numbers = #tpu.dot_dimension_numbers<[1], [0], [0], [1], [0, 0, 1, 1], [], []>} : vector<128x512xbf16>, vector<512x256xbf16>, vector<128x256xf32> -> vector<128x256xf32>
    %c0_9 = arith.constant 0 : index
    %c0_10 = arith.constant 0 : index
    %11 = vector.load %arg5[%c0_9, %c0_10] : memref<1x256xf32, #tpu.memory_space<vmem>>, vector<1x256xf32>
    %12 = vector.broadcast %11 : vector<1x256xf32> to vector<128x256xf32>
    %13 = arith.addf %10, %12 : vector<128x256xf32>
    %cst_11 = arith.constant 0.000000e+00 : f32
    %14 = vector.broadcast %cst_11 : f32 to vector<128x256xf32>
    %15 = arith.maximumf %13, %14 : vector<128x256xf32>
    %16 = arith.truncf %15 : vector<128x256xf32> to vector<128x256xbf16>
    %c0_12 = arith.constant 0 : index
    %c0_13 = arith.constant 0 : index
    %17 = vector.load %arg6[%c0_12, %c0_13] : memref<256x64xbf16, #tpu.memory_space<vmem>>, vector<256x64xbf16>
    %cst_14 = arith.constant dense<0.000000e+00> : vector<128x64xf32>
    %18 = tpu.matmul %16, %17, %cst_14 {dimension_numbers = #tpu.dot_dimension_numbers<[1], [0], [0], [1], [0, 0, 1, 1], [], []>} : vector<128x256xbf16>, vector<256x64xbf16>, vector<128x64xf32> -> vector<128x64xf32>
    %c0_15 = arith.constant 0 : index
    %c0_16 = arith.constant 0 : index
    %19 = vector.load %arg7[%c0_15, %c0_16] : memref<1x64xf32, #tpu.memory_space<vmem>>, vector<1x64xf32>
    %20 = vector.broadcast %19 : vector<1x64xf32> to vector<128x64xf32>
    %21 = arith.addf %18, %20 : vector<128x64xf32>
    %cst_17 = arith.constant 0.000000e+00 : f32
    %22 = vector.broadcast %cst_17 : f32 to vector<128x64xf32>
    %23 = arith.maximumf %21, %22 : vector<128x64xf32>
    %c0_18 = arith.constant 0 : index
    %c0_19 = arith.constant 0 : index
    %24 = vector.load %arg8[%c0_18, %c0_19] : memref<1x64xf32, #tpu.memory_space<vmem>>, vector<1x64xf32>
    %25 = vector.broadcast %24 : vector<1x64xf32> to vector<128x64xf32>
    %26 = arith.mulf %23, %25 : vector<128x64xf32>
    %cst_20 = arith.constant dense<0.000000e+00> : vector<128xf32>
    %27 = vector.multi_reduction <add>, %26, %cst_20 [1] : vector<128x64xf32> to vector<128xf32>
    %28 = vector.shape_cast %27 : vector<128xf32> to vector<128x1xf32>
    %c0_21 = arith.constant 0 : index
    %c0_22 = arith.constant 0 : index
    %29 = vector.load %arg9[%c0_21, %c0_22] : memref<1x1xf32, #tpu.memory_space<vmem>>, vector<1x1xf32>
    %30 = vector.broadcast %29 : vector<1x1xf32> to vector<128x1xf32>
    %31 = arith.addf %28, %30 : vector<128x1xf32>
    %c0_23 = arith.constant 0 : index
    %c0_24 = arith.constant 0 : index
    %32 = vector.load %arg10[%c0_23, %c0_24] : memref<128x1xf32, #tpu.memory_space<vmem>>, vector<128x1xf32>
    tpu.vector_store %arg10[%c0_23, %c0_24], %31 {strides = array<i32>} : memref<128x1xf32, #tpu.memory_space<vmem>>, vector<128x1xf32>,
    return
  }
  func.func @transform_0(%arg0: i32) -> (i32, i32) {
    %c0_i32 = arith.constant 0 : i32
    %c0_i32_0 = arith.constant 0 : i32
    return %arg0, %c0_i32 : i32, i32
  }
  func.func @transform_1(%arg0: i32) -> (i32, i32) {
    %c0_i32 = arith.constant 0 : i32
    %c0_i32_0 = arith.constant 0 : i32
    %c0_i32_1 = arith.constant 0 : i32
    return %c0_i32, %c0_i32_0 : i32, i32
  }
  func.func @transform_2(%arg0: i32) -> (i32, i32) {
    %c0_i32 = arith.constant 0 : i32
    %c0_i32_0 = arith.constant 0 : i32
    %c0_i32_1 = arith.constant 0 : i32
    return %c0_i32, %c0_i32_0 : i32, i32
  }
  func.func @transform_3(%arg0: i32) -> (i32, i32) {
    %c0_i32 = arith.constant 0 : i32
    %c0_i32_0 = arith.constant 0 : i32
    %c0_i32_1 = arith.constant 0 : i32
    return %c0_i32, %c0_i32_0 : i32, i32
  }
  func.func @transform_4(%arg0: i32) -> (i32, i32) {
    %c0_i32 = arith.constant 0 : i32
    %c0_i32_0 = arith.constant 0 : i32
    %c0_i32_1 = arith.constant 0 : i32
    return %c0_i32, %c0_i32_0 : i32, i32
  }
  func.func @transform_5(%arg0: i32) -> (i32, i32) {
    %c0_i32 = arith.constant 0 : i32
    %c0_i32_0 = arith.constant 0 : i32
    %c0_i32_1 = arith.constant 0 : i32
    return %c0_i32, %c0_i32_0 : i32, i32
  }
  func.func @transform_6(%arg0: i32) -> (i32, i32) {
    %c0_i32 = arith.constant 0 : i32
    %c0_i32_0 = arith.constant 0 : i32
    %c0_i32_1 = arith.constant 0 : i32
    return %c0_i32, %c0_i32_0 : i32, i32
  }
  func.func @transform_7(%arg0: i32) -> (i32, i32) {
    %c0_i32 = arith.constant 0 : i32
    %c0_i32_0 = arith.constant 0 : i32
    %c0_i32_1 = arith.constant 0 : i32
    return %c0_i32, %c0_i32_0 : i32, i32
  }
  func.func @transform_8(%arg0: i32) -> (i32, i32) {
    %c0_i32 = arith.constant 0 : i32
    %c0_i32_0 = arith.constant 0 : i32
    %c0_i32_1 = arith.constant 0 : i32
    return %c0_i32, %c0_i32_0 : i32, i32
  }
  func.func @transform_9(%arg0: i32) -> (i32, i32) {
    %c0_i32 = arith.constant 0 : i32
    %c0_i32_0 = arith.constant 0 : i32
    return %arg0, %c0_i32 : i32, i32
  }
}

</mosaic_0001>

<bundles_post_ra>
// kernel: tpu_custom_call.1
= control target key start
LH: loop header
LB: loop body
LE: loop exit
PB: predicated region body
PF: predicated region fallthrough
CT: control target
= control target key end

     0   :  { %s3277_s0 = inlined_call_operand.vmem [shape: bf16[256,8], index: 0, kind: input, shape index: {}]   ;;  %s3278_s1 = inlined_call_operand.vmem [shape: bf16[8,512], index: 1, kind: input, shape index: {}]   ;;  %s3279_s2 = inlined_call_operand.vmem [shape: f32[1,512], index: 2, kind: input, shape index: {}]   ;;  %s3280_s3 = inlined_call_operand.hbm [shape: bf16[512,256], index: 3, kind: input, shape index: {}]   ;;  %s3281_s4 = inlined_call_operand.vmem [shape: f32[1,256], index: 4, kind: input, shape index: {}]   ;;  %s3282_s5 = inlined_call_operand.vmem [shape: bf16[256,64], index: 5, kind: input, shape index: {}]   ;;  %s3283_s6 = inlined_call_operand.vmem [shape: f32[1,64], index: 6, kind: input, shape index: {}]   ;;  %s3284_s7 = inlined_call_operand.vmem [shape: f32[1,64], index: 7, kind: input, shape index: {}]   ;;  %s3285_s8 = inlined_call_operand.<no memory space> [shape: f32[1,1], index: 8, kind: input, shape index: {}]   ;;  %s3286_s9 = inlined_call_operand.vmem [shape: f32[256,1], index: 9, kind: output, shape index: {}]  }
   0x1   :  { %v14_v0 = vstv %s3285_s8 }
   0x2   :  { %15 = vst [vmem:[#allocation2] sm:$0x1] %v14_v0 }
   0x3   :  { %16 = vsyncpa [#allocation4], 0  ;;  %s2623_s11 = smov 0  }
   0x4 LB: > { %s264_s14 = sshll.u32 %s3280_s3, 4  ;;  %s2014_s15 = sadd.s32 4294967295, %s2565_s11   ;;  %s2565_s11 = sphi %s2623_s11, %s22_s11   ;;  %s265_s14 = int_to_ptr.hbm [resolvable:$true] %s264_s14 }
   0x5   : > { %p2016_p0 = scmp.ge.s32.totalorder %s2565_s11, 1  ;;  %p247_p1 = scmp.lt.s32.totalorder %s2565_s11, 3 }
   0x6   : > { %p2509_p2 = scmp.eq.s32.totalorder %s2014_s15, 0  ;;  %s2567_s8 = smov [#allocation3]  }
   0x7   : > { %p248_p3 = pnand %p2016_p0, %p247_p1  ;;  %s266_s16 = sshll.u32 %s2567_s8, 4  ;;  %s267_s16 = int_to_ptr.vmem [resolvable:$true] %s266_s16 }
   0x8   : > { %s2568_s17 = smov 128   ;;  %s2569_s18 = smov 8  }
   0x9   : > { %p2505_p4 = pneg %p248_p3  ;;  %306 = sbr.rel (%p248_p3) target bundleno = 883 (0x373), region = 56 }
   0xb   : > { %p2506_p5 = pnand %p2509_p2, %p2505_p4 }
   0xd   : > { %2508 = dma.hbm_to_vmem [thread:$0]  (!%p2506_p5), %s265_s14, 8192, %s267_s16, [#allocation4], %s2568_s17, %s2568_s17, %s2569_s18  }
   0xe   : > { %2560 = dma.done.wait (%p2509_p2), [#allocation4], 8192  }
   0xf   : > { %2562 = vsyncadd (%p2509_p2), [#allocation4], 4294959104  ;;  %s2021_s19 = sshll.u32 %s2014_s15, 4  ;;  %v372_v1 = vld [vmem:[%s3278_s1] sm:$0xff]  ;;  %v373_v4 = vld [vmem:[%s3278_s1 + $0x8] sm:$0xff]  ;;  %vm459_vm0 = vcmask 1043456  }
  0x10   : > { %p344_p6 = scmp.lt.s32.totalorder %s2021_s19, 31  ;;  %v426_v2 = vunpack.c.l.b16 %v372_v1  ;;  %v427_v3 = vunpack.c.h.b16 %v372_v1  ;;  %v428_v5 = vunpack.c.l.b16 %v373_v4  ;;  %v429_v6 = vunpack.c.h.b16 %v373_v4  ;;  %v2275_v23 = vld [vmem:[#allocation3 + $0x170] sm:$0xf]  ;;  %v2466_v24 = vld [vmem:[#allocation3 + $0x174] sm:$0xf0] }
  0x11   : > { %vm434_vm1 = vcmask 64512   ;;  %v2339_v25 = vld [vmem:[#allocation3 + $0x1f0] sm:$0xf]  ;;  %v2276_v26 = vor.u32 %v2466_v24, %v2275_v23  ;;  %v2482_v27 = vld [vmem:[#allocation3 + $0x1f4] sm:$0xf0]  ;;  %vm1860_vm2 = vcmask 523264  }
  0x12   : > { %s3288_s19 = smov (!%p344_p6, %s2021_s19), 31  ;;  %v430_v7 = vpack.c.b16 %v426_v2, %v426_v2  ;;  %v431_v8 = vpack.c.b16 %v427_v3, %v427_v3  ;;  %v432_v9 = vpack.c.b16 %v428_v5, %v428_v5  ;;  %v433_v10 = vpack.c.b16 %v429_v6, %v429_v6  ;;  %v2267_v29 = vld [vmem:[#allocation3 + $0x160] sm:$0xf]  ;;  %v2464_v30 = vld [vmem:[#allocation3 + $0x164] sm:$0xf0] }
  0x13   : > { %s2022_s20 = sshll.u32 %s3288_s19, 2  ;;  %v2340_v28 = vor.u32 %v2482_v27, %v2339_v25  ;;  %v2331_v31 = vld [vmem:[#allocation3 + $0x1e0] sm:$0xf]  ;;  %v2268_v32 = vor.u32 %v2464_v30, %v2267_v29  ;;  %v2480_v33 = vld [vmem:[#allocation3 + $0x1e4] sm:$0xf0]  ;;  %s2024_s28 = sshll.u32 %s3288_s19, 3 }
  0x14   : > { %s2646_s27 = scalar_lea.vmem %s3277_s0, %s2022_s20  ;;  %v461_v11 = vsel %vm459_vm0, %v430_v7, 0  ;;  %v464_v12 = vsel %vm459_vm0, %v431_v8, 0  ;;  %v467_v15 = vsel %vm459_vm0, %v432_v9, 0  ;;  %v470_v16 = vsel %vm459_vm0, %v433_v10, 0  ;;  %v2147_v34 = vld [vmem:[#allocation3 + $0x70] sm:$0xf]  ;;  %s3238_s10 = scalar_lea.vmem %s3286_s9, %s2024_s28 }
  0x15   : > { %v2411_v13 = vld [vmem:[%s2646_s27] sm:$0xff]  ;;  %479 = vmatpush.bf16.msra.mxu0 %v461_v11  ;;  %2499 = vmatpush.bf16.msra.mxu2 %v461_v11  ;;  %v2412_v17 = vld [vmem:[%s2646_s27 + $0x8] sm:$0xff]  ;;  %v2673_v19 = vld [vmem:[%s2646_s27 + $0x10] sm:$0xff]  ;;  %v2332_v36 = vor.u32 %v2480_v33, %v2331_v31  ;;  %vm1929_vm3 = vcmask 7168  }
  0x16   : > { %v2652_v14 = vld [vmem:[%s2646_s27 + $0x20] sm:$0xff]  ;;  %528 = vmatpush.bf16.msra.mxu1 %v464_v12  ;;  %2500 = vmatpush.bf16.msra.mxu3 %v464_v12  ;;  %v2664_v18 = vld [vmem:[%s2646_s27 + $0x28] sm:$0xff]  ;;  %v2676_v20 = vld [vmem:[%s2646_s27 + $0x30] sm:$0xff] }
  0x17   : > { %v2687_v21 = vld [vmem:[%s2646_s27 + $0x18] sm:$0xff]  ;;  %v2211_v38 = vld [vmem:[#allocation3 + $0xf0] sm:$0xf]  ;;  %v2139_v41 = vld [vmem:[#allocation3 + $0x60] sm:$0xf] }
  0x18   : > { %2057 = vmatmul.msk.bf16.vlgmr.msra.gmra.mxu0 %vm434_vm1, %v2411_v13  ;;  %2061 = vmatmul.msk.bf16.vlgmr.msra.gmra.mxu2 %vm434_vm1, %v2652_v14  ;;  %v2690_v22 = vld [vmem:[%s2646_s27 + $0x38] sm:$0xff]  ;;  %v2432_v42 = vld [vmem:[#allocation3 + $0x64] sm:$0xf0]  ;;  %v2203_v43 = vld [vmem:[#allocation3 + $0xe0] sm:$0xf] }
  0x19   : > { %577 = vmatpush.bf16.msrb.mxu2 %v467_v15  ;;  %2065 = vmatmul.msk.bf16.vlgmr.msra.gmra.mxu1 %vm434_vm1, %v2411_v13  ;;  %v2434_v35 = vld [vmem:[#allocation3 + $0x74] sm:$0xf0]  ;;  %v2140_v44 = vor.u32 %v2432_v42, %v2139_v41  ;;  %v2448_v45 = vld [vmem:[#allocation3 + $0xe4] sm:$0xf0]  ;;  %v2259_v47 = vld [vmem:[#allocation3 + $0x150] sm:$0xf] }
  0x1a   : > { %626 = vmatpush.bf16.msrb.mxu3 %v470_v16  ;;  %v2148_v37 = vor.u32 %v2434_v35, %v2147_v34  ;;  %v2450_v39 = vld [vmem:[#allocation3 + $0xf4] sm:$0xf0]  ;;  %v2204_v46 = vor.u32 %v2448_v45, %v2203_v43  ;;  %v2323_v49 = vld [vmem:[#allocation3 + $0x1d0] sm:$0xf]  ;;  %v2123_v58 = vld [vmem:[#allocation3 + $0x40] sm:$0xf] }
  0x1b   : > { %2069 = vmatmul.msk.bf16.vlgmr.msra.gmra.mxu3 %vm434_vm1, %v2652_v14  ;;  %v2212_v40 = vor.u32 %v2450_v39, %v2211_v38  ;;  %v2462_v48 = vld [vmem:[#allocation3 + $0x154] sm:$0xf0]  ;;  %v2131_v52 = vld [vmem:[#allocation3 + $0x50] sm:$0xf]  ;;  %v2428_v60 = vld [vmem:[#allocation3 + $0x44] sm:$0xf0] }
  0x1c   : > { %1154 = vmatpush.bf16.msrb.mxu0 %v2148_v37  ;;  %v2260_v50 = vor.u32 %v2462_v48, %v2259_v47  ;;  %v2478_v51 = vld [vmem:[#allocation3 + $0x1d4] sm:$0xf0]  ;;  %v2195_v56 = vld [vmem:[#allocation3 + $0xd0] sm:$0xf]  ;;  %v2187_v61 = vld [vmem:[#allocation3 + $0xc0] sm:$0xf]  ;;  %v2124_v63 = vor.u32 %v2428_v60, %v2123_v58 }
  0x1d   : > { %1252 = vmatpush.bf16.msra.mxu2 %v2276_v26  ;;  %1203 = vmatpush.bf16.msrb.mxu1 %v2212_v40  ;;  %v2430_v53 = vld [vmem:[#allocation3 + $0x54] sm:$0xf0]  ;;  %v2324_v54 = vor.u32 %v2478_v51, %v2323_v49  ;;  %v2444_v62 = vld [vmem:[#allocation3 + $0xc4] sm:$0xf0]  ;;  %v2115_v1 = vld [vmem:[#allocation3 + $0x30] sm:$0xf] }
  0x1e   : > { %1301 = vmatpush.bf16.msra.mxu3 %v2340_v28  ;;  %v2132_v55 = vor.u32 %v2430_v53, %v2131_v52  ;;  %v2446_v57 = vld [vmem:[#allocation3 + $0xd4] sm:$0xf0]  ;;  %v2188_v0 = vor.u32 %v2444_v62, %v2187_v61  ;;  %v2179_v3 = vld [vmem:[#allocation3 + $0xb0] sm:$0xf]  ;;  %v2107_v7 = vld [vmem:[#allocation3 + $0x20] sm:$0xf] }
  0x1f   : > { %v2196_v59 = vor.u32 %v2446_v57, %v2195_v56  ;;  %v2426_v2 = vld [vmem:[#allocation3 + $0x34] sm:$0xf0]  ;;  %v2424_v8 = vld [vmem:[#allocation3 + $0x24] sm:$0xf0]  ;;  %v2171_v9 = vld [vmem:[#allocation3 + $0xa0] sm:$0xf] }
  0x20   : > { %1155 = vmatpush.bf16.msrb.mxu0 %v2140_v44  ;;  %v2116_v4 = vor.u32 %v2426_v2, %v2115_v1  ;;  %v2442_v5 = vld [vmem:[#allocation3 + $0xb4] sm:$0xf0]  ;;  %v2108_v10 = vor.u32 %v2424_v8, %v2107_v7  ;;  %v2440_v11 = vld [vmem:[#allocation3 + $0xa4] sm:$0xf0]  ;;  %v2163_v24 = vld [vmem:[#allocation3 + $0x90] sm:$0xf] }
  0x21   : > { %1253 = vmatpush.bf16.msra.mxu2 %v2268_v32  ;;  %1204 = vmatpush.bf16.msrb.mxu1 %v2204_v46  ;;  %v2180_v6 = vor.u32 %v2442_v5, %v2179_v3  ;;  %v2172_v12 = vor.u32 %v2440_v11, %v2171_v9  ;;  %v2460_v15 = vld [vmem:[#allocation3 + $0x144] sm:$0xf0]  ;;  %v2422_v23 = vld [vmem:[#allocation3 + $0x14] sm:$0xf0]  ;;  %v2315_v28 = vld [vmem:[#allocation3 + $0x1c0] sm:$0xf] }
  0x22   : > { %1302 = vmatpush.bf16.msra.mxu3 %v2332_v36  ;;  %v2438_v26 = vld [vmem:[#allocation3 + $0x94] sm:$0xf0]  ;;  %v2476_v29 = vld [vmem:[#allocation3 + $0x1c4] sm:$0xf0]  ;;  %v2091_v30 = vld [vmem:[#allocation3] sm:$0xf] }
  0x23   : > { %v2164_v27 = vor.u32 %v2438_v26, %v2163_v24  ;;  %v2316_v31 = vor.u32 %v2476_v29, %v2315_v28  ;;  %v2155_v32 = vld [vmem:[#allocation3 + $0x80] sm:$0xf]  ;;  %v2436_v33 = vld [vmem:[#allocation3 + $0x84] sm:$0xf0]  ;;  %v2243_v36 = vld [vmem:[#allocation3 + $0x130] sm:$0xf] }
  0x24   : > { %1156 = vmatpush.bf16.msrb.mxu0 %v2132_v55  ;;  %v2156_v35 = vor.u32 %v2436_v33, %v2155_v32  ;;  %v2458_v37 = vld [vmem:[#allocation3 + $0x134] sm:$0xf0]  ;;  %v2307_v39 = vld [vmem:[#allocation3 + $0x1b0] sm:$0xf]  ;;  %v2715_v42 = vld [vmem:[%s3279_s2] sm:$0xf] }
  0x25   : > { %1254 = vmatpush.bf16.msra.mxu2 %v2260_v50  ;;  %1205 = vmatpush.bf16.msrb.mxu1 %v2196_v59  ;;  %v2244_v38 = vor.u32 %v2458_v37, %v2243_v36  ;;  %v2474_v40 = vld [vmem:[#allocation3 + $0x1b4] sm:$0xf0]  ;;  %v2718_v45 = vperm.slane %v2715_v42, 1  ;;  %v2235_v46 = vld [vmem:[#allocation3 + $0x120] sm:$0xf] }
  0x26   : > { %1303 = vmatpush.bf16.msra.mxu3 %v2324_v54  ;;  %v2308_v41 = vor.u32 %v2474_v40, %v2307_v39  ;;  %v2456_v47 = vld [vmem:[#allocation3 + $0x124] sm:$0xf0]  ;;  %v2299_v60 = vld [vmem:[#allocation3 + $0x1a0] sm:$0xf] }
  0x27   : > { %v2236_v49 = vor.u32 %v2456_v47, %v2235_v46  ;;  %v2472_v61 = vld [vmem:[#allocation3 + $0x1a4] sm:$0xf0] }
  0x28   : > { %2058 = vmatmul.msk.bf16.gmra.mxu0 %vm434_vm1, %v2412_v17  ;;  %2062 = vmatmul.msk.bf16.gmra.mxu2 %vm434_vm1, %v2664_v18 }
  0x29   : > { %2066 = vmatmul.msk.bf16.gmra.mxu1 %vm434_vm1, %v2412_v17  ;;  %1157 = vmatpush.bf16.msrb.mxu0 %v2124_v63  ;;  %v2300_v63 = vor.u32 %v2472_v61, %v2299_v60 }
  0x2a   : > { %1206 = vmatpush.bf16.msrb.mxu1 %v2188_v0  ;;  %1304 = vmatpush.bf16.msra.mxu3 %v2316_v31 }
  0x2b   : > { %2070 = vmatmul.msk.bf16.gmra.mxu3 %vm434_vm1, %v2664_v18 }
  0x2d   : > { %1158 = vmatpush.bf16.msrb.mxu0 %v2116_v4 }
  0x2e   : > { %1207 = vmatpush.bf16.msrb.mxu1 %v2180_v6  ;;  %1305 = vmatpush.bf16.msra.mxu3 %v2308_v41 }
  0x31   : > { %1159 = vmatpush.bf16.msrb.mxu0 %v2108_v10 }
  0x32   : > { %1208 = vmatpush.bf16.msrb.mxu1 %v2172_v12  ;;  %1306 = vmatpush.bf16.msra.mxu3 %v2300_v63 }
  0x36   : > { %1209 = vmatpush.bf16.msrb.mxu1 %v2164_v27 }
  0x38   : > { %2059 = vmatmul.msk.bf16.gmra.mxu0 %vm434_vm1, %v2673_v19  ;;  %2063 = vmatmul.msk.bf16.gmra.mxu2 %vm434_vm1, %v2676_v20 }
  0x39   : > { %2067 = vmatmul.msk.bf16.gmra.mxu1 %vm434_vm1, %v2673_v19 }
  0x3a   : > { %1210 = vmatpush.bf16.msrb.mxu1 %v2156_v35  ;;  %v2470_v35 = vld [vmem:[#allocation3 + $0x194] sm:$0xf0] }
  0x3b   : > { %2071 = vmatmul.msk.bf16.gmra.mxu3 %vm434_vm1, %v2676_v20 }
  0x48   : > { %2060 = vmatmul.msk.bf16.gmra.mxu0 %vm434_vm1, %v2687_v21  ;;  %2064 = vmatmul.msk.bf16.gmra.mxu2 %vm434_vm1, %v2690_v22 }
  0x49   : > { %2068 = vmatmul.msk.bf16.gmra.mxu1 %vm434_vm1, %v2687_v21 }
  0x4b   : > { %2072 = vmatmul.msk.bf16.gmra.mxu3 %vm434_vm1, %v2690_v22 }
  0x58   : > { %2073 = vmatmul.msk.bf16.vlgmr.msrb.gmra.mxu2 %vm434_vm1, %v2411_v13 }
  0x5b   : > { %2081 = vmatmul.msk.bf16.vlgmr.msrb.gmra.mxu3 %vm434_vm1, %v2411_v13  ;;  %v2251_v13 = vld [vmem:[#allocation3 + $0x140] sm:$0xf] }
  0x5c   : > { %v2252_v16 = vor.u32 %v2460_v15, %v2251_v13  ;;  %v2227_v15 = vld [vmem:[#allocation3 + $0x110] sm:$0xf] }
  0x5e   : > { %1255 = vmatpush.bf16.msra.mxu2 %v2252_v16  ;;  %v2454_v16 = vld [vmem:[#allocation3 + $0x114] sm:$0xf0] }
  0x5f   : > { %v2228_v24 = vor.u32 %v2454_v16, %v2227_v15 }
  0x62   : > { %1256 = vmatpush.bf16.msra.mxu2 %v2244_v38 }
  0x66   : > { %1257 = vmatpush.bf16.msra.mxu2 %v2236_v49 }
  0x68   : > { %2074 = vmatmul.msk.bf16.gmra.mxu2 %vm434_vm1, %v2412_v17 }
  0x6a   : > { %1258 = vmatpush.bf16.msra.mxu2 %v2228_v24 }
  0x6b   : > { %2082 = vmatmul.msk.bf16.gmra.mxu3 %vm434_vm1, %v2412_v17  ;;  %v2099_v17 = vld [vmem:[#allocation3 + $0x10] sm:$0xf] }
  0x6c   : > { %v2100_v25 = vor.u32 %v2422_v23, %v2099_v17 }
  0x6e   : > { %1160 = vmatpush.bf16.msrb.mxu0 %v2100_v25 }
  0x78   : > { %2075 = vmatmul.msk.bf16.gmra.mxu2 %vm434_vm1, %v2673_v19 }
  0x7b   : > { %2083 = vmatmul.msk.bf16.gmra.mxu3 %vm434_vm1, %v2673_v19  ;;  %v2420_v19 = vld [vmem:[#allocation3 + $0x4] sm:$0xf0] }
  0x7c   : > { %v2092_v34 = vor.u32 %v2420_v19, %v2091_v30 }
  0x7e   : > { %1161 = vmatpush.bf16.msrb.mxu0 %v2092_v34  ;;  %v2291_v34 = vld [vmem:[#allocation3 + $0x190] sm:$0xf] }
  0x7f   : > { %v2292_v37 = vor.u32 %v2470_v35, %v2291_v34  ;;  %v2465_v34 = vld [vmem:[#allocation3 + $0x174] sm:$0xf]  ;;  %v2277_v35 = vld [vmem:[#allocation3 + $0x178] sm:$0xf0] }
  0x81   : > { %1307 = vmatpush.bf16.msra.mxu3 %v2292_v37 }
  0x88   : > { %2076 = vmatmul.msk.bf16.gmra.mxu2 %vm434_vm1, %v2687_v21 }
  0x8b   : > { %2084 = vmatmul.msk.bf16.gmra.mxu3 %vm434_vm1, %v2687_v21  ;;  %v2721_v21 = vperm.slane %v2715_v42, 0 }
  0x95   : > { %v481_v43 = vpop.f32.mrf.mxu0 }
  0x96   : > { %v530_v44 = vpop.f32.mrf.mxu1  ;;  %v482_v48 = vadd.f32 %v481_v43, %v2721_v21 }
  0x97   : > { %v531_v50 = vadd.f32 %v530_v44, %v2718_v45 }
  0x98   : > { %2077 = vmatmul.msk.bf16.gmra.mxu2 %vm434_vm1, %v2652_v14  ;;  %v668_v56 = vmax.f32 %v482_v48, 0.0 }
  0x9b   : > { %2085 = vmatmul.msk.bf16.gmra.mxu3 %vm434_vm1, %v2652_v14  ;;  %v501_v51 = vpop.f32.mrf.mxu2  ;;  %v669_v14 = vmax.f32 %v531_v50, 0.0 }
  0x9c   : > { %v502_v52 = vadd.f32 %v501_v51, %v2721_v21 }
  0x9d   : > { %v483_v55 = vpop.f32.mrf.mxu0 }
  0x9e   : > { %v550_v53 = vpop.f32.mrf.mxu3  ;;  %v484_v57 = vadd.f32 %v483_v55, %v2721_v21  ;;  %v532_v58 = vpop.f32.mrf.mxu1  ;;  %v700_v8 = vmax.f32 %v502_v52, 0.0 }
  0x9f   : > { %v551_v54 = vadd.f32 %v550_v53, %v2718_v45  ;;  %v533_v59 = vadd.f32 %v532_v58, %v2718_v45  ;;  %v2219_v53 = vld [vmem:[#allocation3 + $0x100] sm:$0xf] }
  0xa0   : > { %v672_v62 = vmax.f32 %v484_v57, 0.0 }
  0xa1   : > { %v673_v0 = vmax.f32 %v533_v59, 0.0  ;;  %v701_v11 = vmax.f32 %v551_v54, 0.0  ;;  %v2452_v54 = vld [vmem:[#allocation3 + $0x104] sm:$0xf0] }
  0xa2   : > { %v2733_v1 = vpack.c.bf16 %v672_v62, %v668_v56  ;;  %v2220_v55 = vor.u32 %v2452_v54, %v2219_v53  ;;  %v2481_v53 = vld [vmem:[#allocation3 + $0x1f4] sm:$0xf]  ;;  %v2341_v54 = vld [vmem:[#allocation3 + $0x1f8] sm:$0xf0] }
  0xa3   : > { %v503_v2 = vpop.f32.mrf.mxu2  ;;  %v2735_v3 = vpack.c.bf16 %v673_v0, %v669_v14 }
  0xa4   : > { %v504_v4 = vadd.f32 %v503_v2, %v2721_v21  ;;  %1162 = vmatmul.bf16.vlgmr.msrb.gmra.mxu0 %v2733_v1  ;;  %1259 = vmatpush.bf16.msra.mxu2 %v2220_v55 }
  0xa5   : > { %1211 = vmatmul.bf16.vlgmr.msrb.gmra.mxu1 %v2735_v3  ;;  %v486_v7 = vpop.f32.mrf.mxu0 }
  0xa6   : > { %v552_v5 = vpop.f32.mrf.mxu3  ;;  %v704_v9 = vmax.f32 %v504_v4, 0.0  ;;  %v535_v10 = vpop.f32.mrf.mxu1  ;;  %v487_v23 = vadd.f32 %v486_v7, %v2721_v21  ;;  %v2468_v7 = vld [vmem:[#allocation3 + $0x184] sm:$0xf0] }
  0xa7   : > { %v553_v6 = vadd.f32 %v552_v5, %v2718_v45  ;;  %v536_v25 = vadd.f32 %v535_v10, %v2718_v45 }
  0xa8   : > { %2078 = vmatmul.msk.bf16.gmra.mxu2 %vm434_vm1, %v2664_v18  ;;  %v2743_v13 = vpack.c.bf16 %v704_v9, %v700_v8  ;;  %v676_v31 = vmax.f32 %v487_v23, 0.0 }
  0xa9   : > { %v705_v12 = vmax.f32 %v553_v6, 0.0  ;;  %v677_v32 = vmax.f32 %v536_v25, 0.0  ;;  %v2283_v6 = vld [vmem:[#allocation3 + $0x180] sm:$0xf] }
  0xaa   : > { %v2284_v9 = vor.u32 %v2468_v7, %v2283_v6 }
  0xab   : > { %2086 = vmatmul.msk.bf16.gmra.mxu3 %vm434_vm1, %v2664_v18  ;;  %v2747_v17 = vpack.c.bf16 %v705_v12, %v701_v11  ;;  %v506_v26 = vpop.f32.mrf.mxu2 }
  0xac   : > { %v507_v27 = vadd.f32 %v506_v26, %v2721_v21  ;;  %1308 = vmatpush.bf16.msra.mxu3 %v2284_v9 }
  0xad   : > { %v488_v30 = vpop.f32.mrf.mxu0 }
  0xae   : > { %v555_v28 = vpop.f32.mrf.mxu3  ;;  %v489_v18 = vadd.f32 %v488_v30, %v2721_v21  ;;  %v537_v19 = vpop.f32.mrf.mxu1  ;;  %v708_v48 = vmax.f32 %v507_v27, 0.0 }
  0xaf   : > { %v556_v29 = vadd.f32 %v555_v28, %v2718_v45  ;;  %v538_v33 = vadd.f32 %v537_v19, %v2718_v45 }
  0xb0   : > { %v680_v36 = vmax.f32 %v489_v18, 0.0 }
  0xb1   : > { %v681_v38 = vmax.f32 %v538_v33, 0.0  ;;  %v709_v51 = vmax.f32 %v556_v29, 0.0 }
  0xb2   : > { %v2755_v39 = vpack.c.bf16 %v680_v36, %v676_v31 }
  0xb3   : > { %v508_v40 = vpop.f32.mrf.mxu2  ;;  %v2757_v41 = vpack.c.bf16 %v681_v38, %v677_v32  ;;  %v2280_v38 = vor.u32 %v2465_v34, %v2277_v35 }
  0xb4   : > { %v509_v43 = vadd.f32 %v508_v40, %v2721_v21  ;;  %1167 = vmatmul.bf16.gmra.mxu0 %v2755_v39 }
  0xb5   : > { %1216 = vmatmul.bf16.gmra.mxu1 %v2757_v41  ;;  %v491_v47 = vpop.f32.mrf.mxu0  ;;  %1448 = vmatpush.bf16.msrb.mxu2 %v2280_v38 }
  0xb6   : > { %v557_v44 = vpop.f32.mrf.mxu3  ;;  %v712_v49 = vmax.f32 %v509_v43, 0.0  ;;  %v540_v50 = vpop.f32.mrf.mxu1  ;;  %v492_v58 = vadd.f32 %v491_v47, %v2721_v21 }
  0xb7   : > { %v558_v46 = vadd.f32 %v557_v44, %v2718_v45  ;;  %v541_v14 = vadd.f32 %v540_v50, %v2718_v45  ;;  %v2149_v50 = vld [vmem:[#allocation3 + $0x78] sm:$0xf0] }
  0xb8   : > { %2079 = vmatmul.msk.bf16.gmra.mxu2 %vm434_vm1, %v2676_v20  ;;  %v2765_v56 = vpack.c.bf16 %v712_v49, %v708_v48  ;;  %v684_v0 = vmax.f32 %v492_v58, 0.0  ;;  %v2433_v49 = vld [vmem:[#allocation3 + $0x74] sm:$0xf]  ;;  %v2344_v58 = vor.u32 %v2481_v53, %v2341_v54  ;;  %v2133_v54 = vld [vmem:[#allocation3 + $0x58] sm:$0xf0] }
  0xb9   : > { %v713_v52 = vmax.f32 %v558_v46, 0.0  ;;  %v685_v5 = vmax.f32 %v541_v14, 0.0  ;;  %v2449_v14 = vld [vmem:[#allocation3 + $0xf4] sm:$0xf] }
  0xba   : > { %1497 = vmatpush.bf16.msrb.mxu3 %v2344_v58  ;;  %v2197_v58 = vld [vmem:[#allocation3 + $0xd8] sm:$0xf0] }
  0xbb   : > { %2087 = vmatmul.msk.bf16.gmra.mxu3 %vm434_vm1, %v2676_v20  ;;  %v2769_v57 = vpack.c.bf16 %v713_v52, %v709_v51  ;;  %v511_v59 = vpop.f32.mrf.mxu2  ;;  %v2152_v52 = vor.u32 %v2433_v49, %v2149_v50  ;;  %v2461_v49 = vld [vmem:[#allocation3 + $0x154] sm:$0xf]  ;;  %v2261_v50 = vld [vmem:[#allocation3 + $0x158] sm:$0xf0] }
  0xbc   : > { %v512_v60 = vadd.f32 %v511_v59, %v2721_v21  ;;  %v2213_v59 = vld [vmem:[#allocation3 + $0xf8] sm:$0xf0]  ;;  %v2264_v53 = vor.u32 %v2461_v49, %v2261_v50  ;;  %v2459_v49 = vld [vmem:[#allocation3 + $0x144] sm:$0xf]  ;;  %v2253_v50 = vld [vmem:[#allocation3 + $0x148] sm:$0xf0] }
  0xbd   : > { %v493_v63 = vpop.f32.mrf.mxu0  ;;  %1350 = vmatpush.bf16.msra.mxu0 %v2152_v52 }
  0xbe   : > { %v560_v61 = vpop.f32.mrf.mxu3  ;;  %v494_v2 = vadd.f32 %v493_v63, %v2721_v21  ;;  %v542_v4 = vpop.f32.mrf.mxu1  ;;  %v716_v26 = vmax.f32 %v512_v60, 0.0 }
  0xbf   : > { %v561_v62 = vadd.f32 %v560_v61, %v2718_v45  ;;  %v543_v20 = vadd.f32 %v542_v4, %v2718_v45  ;;  %v2216_v61 = vor.u32 %v2449_v14, %v2213_v59 }
  0xc0   : > { %v688_v8 = vmax.f32 %v494_v2, 0.0 }
  0xc1   : > { %v689_v10 = vmax.f32 %v543_v20, 0.0  ;;  %v717_v29 = vmax.f32 %v561_v62, 0.0  ;;  %1399 = vmatpush.bf16.msra.mxu1 %v2216_v61  ;;  %v2477_v61 = vld [vmem:[#allocation3 + $0x1d4] sm:$0xf] }
  0xc2   : > { %v2777_v11 = vpack.c.bf16 %v688_v8, %v684_v0 }
  0xc3   : > { %v513_v12 = vpop.f32.mrf.mxu2  ;;  %v2779_v15 = vpack.c.bf16 %v689_v10, %v685_v5 }
  0xc4   : > { %v514_v16 = vadd.f32 %v513_v12, %v2721_v21  ;;  %1172 = vmatmul.bf16.gmra.mxu0 %v2777_v11  ;;  %v2463_v12 = vld [vmem:[#allocation3 + $0x164] sm:$0xf] }
  0xc5   : > { %1221 = vmatmul.bf16.gmra.mxu1 %v2779_v15  ;;  %v496_v25 = vpop.f32.mrf.mxu0 }
  0xc6   : > { %v562_v23 = vpop.f32.mrf.mxu3  ;;  %v720_v27 = vmax.f32 %v514_v16, 0.0  ;;  %v545_v28 = vpop.f32.mrf.mxu1  ;;  %v497_v19 = vadd.f32 %v496_v25, %v2721_v21  ;;  %v2269_v16 = vld [vmem:[#allocation3 + $0x168] sm:$0xf0]  ;;  %v2431_v25 = vld [vmem:[#allocation3 + $0x64] sm:$0xf] }
  0xc7   : > { %v563_v24 = vadd.f32 %v562_v23, %v2718_v45  ;;  %v546_v32 = vadd.f32 %v545_v28, %v2718_v45  ;;  %v2272_v23 = vor.u32 %v2463_v12, %v2269_v16  ;;  %v2479_v28 = vld [vmem:[#allocation3 + $0x1e4] sm:$0xf] }
  0xc8   : > { %2080 = vmatmul.msk.bf16.gmra.mxu2 %vm434_vm1, %v2690_v22  ;;  %v2787_v31 = vpack.c.bf16 %v720_v27, %v716_v26  ;;  %v692_v44 = vmax.f32 %v497_v19, 0.0  ;;  %v2141_v26 = vld [vmem:[#allocation3 + $0x68] sm:$0xf0] }
  0xc9   : > { %v721_v30 = vmax.f32 %v563_v24, 0.0  ;;  %v693_v47 = vmax.f32 %v546_v32, 0.0  ;;  %v2812_v24 = vperm.slane %v2715_v42, 2  ;;  %1449 = vmatpush.bf16.msrb.mxu2 %v2272_v23  ;;  %v2144_v27 = vor.u32 %v2431_v25, %v2141_v26  ;;  %v2205_v32 = vld [vmem:[#allocation3 + $0xe8] sm:$0xf0] }
  0xca   : > { %v2117_v23 = vld [vmem:[#allocation3 + $0x38] sm:$0xf0]  ;;  %v2441_v25 = vld [vmem:[#allocation3 + $0xb4] sm:$0xf] }
  0xcb   : > { %2088 = vmatmul.msk.bf16.gmra.mxu3 %vm434_vm1, %v2690_v22  ;;  %v2791_v18 = vpack.c.bf16 %v721_v30, %v717_v29  ;;  %v516_v33 = vpop.f32.mrf.mxu2  ;;  %v2333_v29 = vld [vmem:[#allocation3 + $0x1e8] sm:$0xf0]  ;;  %v2447_v30 = vld [vmem:[#allocation3 + $0xe4] sm:$0xf]  ;;  %1351 = vmatpush.bf16.msra.mxu0 %v2144_v27 }
  0xcc   : > { %v517_v36 = vadd.f32 %v516_v33, %v2721_v21  ;;  %v2336_v19 = vor.u32 %v2479_v28, %v2333_v29  ;;  %v2208_v34 = vor.u32 %v2447_v30, %v2205_v32  ;;  %v2181_v29 = vld [vmem:[#allocation3 + $0xb8] sm:$0xf0] }
  0xcd   : > { %v498_v43 = vpop.f32.mrf.mxu0  ;;  %1450 = vmatpush.bf16.msrb.mxu2 %v2264_v53  ;;  %v2256_v53 = vor.u32 %v2459_v49, %v2253_v50 }
  0xce   : > { %v565_v37 = vpop.f32.mrf.mxu3  ;;  %v499_v46 = vadd.f32 %v498_v43, %v2721_v21  ;;  %v547_v22 = vpop.f32.mrf.mxu1  ;;  %v724_v5 = vmax.f32 %v517_v36, 0.0  ;;  %1498 = vmatpush.bf16.msrb.mxu3 %v2336_v19  ;;  %1400 = vmatpush.bf16.msra.mxu1 %v2208_v34  ;;  %v2184_v19 = vor.u32 %v2441_v25, %v2181_v29 }
  0xcf   : > { %v566_v40 = vadd.f32 %v565_v37, %v2718_v45  ;;  %v548_v48 = vadd.f32 %v547_v22, %v2718_v45 }
  0xd0   : > { %v696_v51 = vmax.f32 %v499_v46, 0.0 }
  0xd1   : > { %v697_v55 = vmax.f32 %v548_v48, 0.0  ;;  %v725_v6 = vmax.f32 %v566_v40, 0.0  ;;  %1451 = vmatpush.bf16.msrb.mxu2 %v2256_v53 }
  0xd2   : > { %v2799_v60 = vpack.c.bf16 %v696_v51, %v692_v44  ;;  %v2429_v51 = vld [vmem:[#allocation3 + $0x54] sm:$0xf] }
  0xd3   : > { %v518_v62 = vpop.f32.mrf.mxu2  ;;  %v2801_v63 = vpack.c.bf16 %v697_v55, %v693_v47  ;;  %v2445_v55 = vld [vmem:[#allocation3 + $0xd4] sm:$0xf]  ;;  %v2136_v14 = vor.u32 %v2429_v51, %v2133_v54  ;;  %v2101_v54 = vld [vmem:[#allocation3 + $0x18] sm:$0xf0] }
  0xd4   : > { %v519_v0 = vadd.f32 %v518_v62, %v2721_v21  ;;  %1177 = vmatmul.bf16.gmra.mxu0 %v2799_v60  ;;  %v2200_v59 = vor.u32 %v2445_v55, %v2197_v58  ;;  %v2325_v62 = vld [vmem:[#allocation3 + $0x1d8] sm:$0xf0]  ;;  %v2421_v51 = vld [vmem:[#allocation3 + $0x14] sm:$0xf] }
  0xd5   : > { %1226 = vmatmul.bf16.gmra.mxu1 %v2801_v63  ;;  %1352 = vmatpush.bf16.msra.mxu0 %v2136_v14  ;;  %v2437_v55 = vld [vmem:[#allocation3 + $0x94] sm:$0xf]  ;;  %v2165_v58 = vld [vmem:[#allocation3 + $0x98] sm:$0xf0]  ;;  %v2104_v14 = vor.u32 %v2421_v51, %v2101_v54 }
  0xd6   : > { %v567_v2 = vpop.f32.mrf.mxu3  ;;  %v728_v20 = vmax.f32 %v519_v0, 0.0  ;;  %1401 = vmatpush.bf16.msra.mxu1 %v2200_v59  ;;  %v2328_v0 = vor.u32 %v2477_v61, %v2325_v62  ;;  %v2168_v59 = vor.u32 %v2437_v55, %v2165_v58  ;;  %v2475_v61 = vld [vmem:[#allocation3 + $0x1c4] sm:$0xf]  ;;  %v2317_v62 = vld [vmem:[#allocation3 + $0x1c8] sm:$0xf0] }
  0xd7   : > { %v568_v4 = vadd.f32 %v567_v2, %v2718_v45  ;;  %v2815_v45 = vperm.slane %v2715_v42, 3  ;;  %v2427_v2 = vld [vmem:[#allocation3 + $0x44] sm:$0xf] }
  0xd8   : > { %v2807_v8 = vpack.c.bf16 %v728_v20, %v724_v5  ;;  %v2443_v5 = vld [vmem:[#allocation3 + $0xc4] sm:$0xf]  ;;  %1499 = vmatpush.bf16.msrb.mxu3 %v2328_v0  ;;  %v2320_v0 = vor.u32 %v2475_v61, %v2317_v62 }
  0xd9   : > { %v729_v7 = vmax.f32 %v568_v4, 0.0  ;;  %v2125_v4 = vld [vmem:[#allocation3 + $0x48] sm:$0xf0]  ;;  %v2455_v62 = vld [vmem:[#allocation3 + $0x124] sm:$0xf] }
  0xda   : > { %v2128_v20 = vor.u32 %v2427_v2, %v2125_v4  ;;  %v2419_v2 = vld [vmem:[#allocation3 + $0x4] sm:$0xf]  ;;  %v2093_v4 = vld [vmem:[#allocation3 + $0x8] sm:$0xf0] }
  0xdb   : > { %v2809_v9 = vpack.c.bf16 %v729_v7, %v725_v6  ;;  %v579_v10 = vpop.f32.mrf.mxu2  ;;  %v2189_v6 = vld [vmem:[#allocation3 + $0xc8] sm:$0xf0] }
  0xdc   : > { %v580_v33 = vadd.f32 %v579_v10, %v2812_v24  ;;  %v2192_v10 = vor.u32 %v2443_v5, %v2189_v6  ;;  %1353 = vmatpush.bf16.msra.mxu0 %v2128_v20  ;;  %v2096_v5 = vor.u32 %v2419_v2, %v2093_v4  ;;  %v2435_v20 = vld [vmem:[#allocation3 + $0x84] sm:$0xf]  ;;  %v2157_v6 = vld [vmem:[#allocation3 + $0x88] sm:$0xf0]  ;;  %1500 = vmatpush.bf16.msrb.mxu3 %v2320_v0 }
  0xdd   : > { %v2237_v0 = vld [vmem:[#allocation3 + $0x128] sm:$0xf0]  ;;  %v2471_v4 = vld [vmem:[#allocation3 + $0x1a4] sm:$0xf] }
  0xde   : > { %v628_v21 = vpop.f32.mrf.mxu3  ;;  %v670_v40 = vmax.f32 %v580_v33, 0.0  ;;  %1402 = vmatpush.bf16.msra.mxu1 %v2192_v10  ;;  %v2160_v10 = vor.u32 %v2435_v20, %v2157_v6  ;;  %v2240_v2 = vor.u32 %v2455_v62, %v2237_v0 }
  0xdf   : > { %v629_v35 = vadd.f32 %v628_v21, %v2815_v45  ;;  %v2425_v21 = vld [vmem:[#allocation3 + $0x34] sm:$0xf] }
  0xe0   : > { %v2120_v28 = vor.u32 %v2425_v21, %v2117_v23 }
  0xe1   : > { %v671_v44 = vmax.f32 %v629_v35, 0.0 }
  0xe2   : > { %1354 = vmatpush.bf16.msra.mxu0 %v2120_v28  ;;  %1403 = vmatpush.bf16.msra.mxu1 %v2184_v19 }
  0xe3   : > { %v581_v36 = vpop.f32.mrf.mxu2 }
  0xe4   : > { %v582_v37 = vadd.f32 %v581_v36, %v2812_v24  ;;  %1182 = vmatmul.bf16.gmra.mxu0 %v2743_v13  ;;  %v2423_v36 = vld [vmem:[#allocation3 + $0x24] sm:$0xf] }
  0xe5   : > { %1231 = vmatmul.bf16.gmra.mxu1 %v2747_v17 }
  0xe6   : > { %v630_v42 = vpop.f32.mrf.mxu3  ;;  %v674_v43 = vmax.f32 %v582_v37, 0.0  ;;  %v2109_v37 = vld [vmem:[#allocation3 + $0x28] sm:$0xf0] }
  0xe7   : > { %v631_v38 = vadd.f32 %v630_v42, %v2815_v45 }
  0xe8   : > { %v2823_v22 = vpack.c.bf16 %v674_v43, %v670_v40  ;;  %v2439_v40 = vld [vmem:[#allocation3 + $0xa4] sm:$0xf]  ;;  %v2173_v43 = vld [vmem:[#allocation3 + $0xa8] sm:$0xf0] }
  0xe9   : > { %v675_v46 = vmax.f32 %v631_v38, 0.0  ;;  %v2112_v38 = vor.u32 %v2423_v36, %v2109_v37  ;;  %v2473_v37 = vld [vmem:[#allocation3 + $0x1b4] sm:$0xf] }
  0xea   : > { %1260 = vmatmul.bf16.vlgmr.msra.gmra.mxu2 %v2823_v22 }
  0xeb   : > { %v2825_v47 = vpack.c.bf16 %v675_v46, %v671_v44  ;;  %v584_v48 = vpop.f32.mrf.mxu2  ;;  %v2176_v46 = vor.u32 %v2439_v40, %v2173_v43  ;;  %1355 = vmatpush.bf16.msra.mxu0 %v2112_v38  ;;  %v2309_v38 = vld [vmem:[#allocation3 + $0x1b8] sm:$0xf0] }
  0xec   : > { %v585_v7 = vadd.f32 %v584_v48, %v2812_v24  ;;  %v2312_v40 = vor.u32 %v2473_v37, %v2309_v38  ;;  %v2469_v38 = vld [vmem:[#allocation3 + $0x194] sm:$0xf] }
  0xed   : > { %1309 = vmatmul.bf16.vlgmr.msra.gmra.mxu3 %v2825_v47  ;;  %1404 = vmatpush.bf16.msra.mxu1 %v2176_v46 }
  0xee   : > { %v633_v52 = vpop.f32.mrf.mxu3  ;;  %v678_v32 = vmax.f32 %v585_v7, 0.0  ;;  %1501 = vmatpush.bf16.msrb.mxu3 %v2312_v40  ;;  %v2293_v40 = vld [vmem:[#allocation3 + $0x198] sm:$0xf0] }
  0xef   : > { %v634_v12 = vadd.f32 %v633_v52, %v2815_v45  ;;  %1356 = vmatpush.bf16.msra.mxu0 %v2104_v14 }
  0xf1   : > { %v679_v34 = vmax.f32 %v634_v12, 0.0  ;;  %1405 = vmatpush.bf16.msra.mxu1 %v2168_v59 }
  0xf3   : > { %v586_v16 = vpop.f32.mrf.mxu2  ;;  %1357 = vmatpush.bf16.msra.mxu0 %v2096_v5  ;;  %v2301_v5 = vld [vmem:[#allocation3 + $0x1a8] sm:$0xf0] }
  0xf4   : > { %v587_v26 = vadd.f32 %v586_v16, %v2812_v24  ;;  %1187 = vmatmul.bf16.gmra.mxu0 %v2765_v56  ;;  %v2304_v20 = vor.u32 %v2471_v4, %v2301_v5 }
  0xf5   : > { %1236 = vmatmul.bf16.gmra.mxu1 %v2769_v57 }
  0xf6   : > { %v635_v27 = vpop.f32.mrf.mxu3  ;;  %v682_v33 = vmax.f32 %v587_v26, 0.0  ;;  %1406 = vmatpush.bf16.msra.mxu1 %v2160_v10  ;;  %1502 = vmatpush.bf16.msrb.mxu3 %v2304_v20  ;;  %v2451_v20 = vld [vmem:[#allocation3 + $0x104] sm:$0xf] }
  0xf7   : > { %v636_v30 = vadd.f32 %v635_v27, %v2815_v45 }
  0xf8   : > { %v2835_v42 = vpack.c.bf16 %v682_v33, %v678_v32 }
  0xf9   : > { %v683_v35 = vmax.f32 %v636_v30, 0.0 }
  0xfa   : > { %1265 = vmatmul.bf16.gmra.mxu2 %v2835_v42 }
  0xfb   : > { %v2837_v44 = vpack.c.bf16 %v683_v35, %v679_v34  ;;  %v589_v48 = vpop.f32.mrf.mxu2  ;;  %v2457_v34 = vld [vmem:[#allocation3 + $0x134] sm:$0xf]  ;;  %v2245_v35 = vld [vmem:[#allocation3 + $0x138] sm:$0xf0] }
  0xfc   : > { %v590_v7 = vadd.f32 %v589_v48, %v2812_v24  ;;  %v2248_v36 = vor.u32 %v2457_v34, %v2245_v35 }
  0xfd   : > { %1314 = vmatmul.bf16.gmra.mxu3 %v2837_v44 }
  0xfe   : > { %v638_v52 = vpop.f32.mrf.mxu3  ;;  %v686_v26 = vmax.f32 %v590_v7, 0.0  ;;  %1452 = vmatpush.bf16.msrb.mxu2 %v2248_v36  ;;  %v2453_v36 = vld [vmem:[#allocation3 + $0x114] sm:$0xf] }
  0xff   : > { %v639_v12 = vadd.f32 %v638_v52, %v2815_v45 }
 0x101   : > { %v687_v28 = vmax.f32 %v639_v12, 0.0 }
 0x102   : > { %1453 = vmatpush.bf16.msrb.mxu2 %v2240_v2 }
 0x103   : > { %v591_v16 = vpop.f32.mrf.mxu2 }
 0x104   : > { %v592_v21 = vadd.f32 %v591_v16, %v2812_v24  ;;  %1192 = vmatmul.bf16.gmra.mxu0 %v2787_v31 }
 0x105   : > { %1241 = vmatmul.bf16.gmra.mxu1 %v2791_v18 }
 0x106   : > { %v640_v23 = vpop.f32.mrf.mxu3  ;;  %v690_v27 = vmax.f32 %v592_v21, 0.0 }
 0x107   : > { %v641_v25 = vadd.f32 %v640_v23, %v2815_v45 }
 0x108   : > { %v2847_v30 = vpack.c.bf16 %v690_v27, %v686_v26 }
 0x109   : > { %v691_v29 = vmax.f32 %v641_v25, 0.0 }
 0x10a   : > { %1270 = vmatmul.bf16.gmra.mxu2 %v2847_v30 }
 0x10b   : > { %v2849_v19 = vpack.c.bf16 %v691_v29, %v687_v28  ;;  %v594_v32 = vpop.f32.mrf.mxu2 }
 0x10c   : > { %v595_v43 = vadd.f32 %v594_v32, %v2812_v24 }
 0x10d   : > { %1319 = vmatmul.bf16.gmra.mxu3 %v2849_v19 }
 0x10e   : > { %v643_v33 = vpop.f32.mrf.mxu3  ;;  %v694_v52 = vmax.f32 %v595_v43, 0.0  ;;  %v2296_v43 = vor.u32 %v2469_v38, %v2293_v40 }
 0x10f   : > { %v644_v46 = vadd.f32 %v643_v33, %v2815_v45 }
 0x110   : > { %1503 = vmatpush.bf16.msrb.mxu3 %v2296_v43 }
 0x111   : > { %v695_v54 = vmax.f32 %v644_v46, 0.0 }
 0x113   : > { %v596_v48 = vpop.f32.mrf.mxu2 }
 0x114   : > { %v597_v49 = vadd.f32 %v596_v48, %v2812_v24  ;;  %1197 = vmatmul.bf16.gmra.mxu0 %v2807_v8 }
 0x115   : > { %1246 = vmatmul.bf16.gmra.mxu1 %v2809_v9 }
 0x116   : > { %v645_v50 = vpop.f32.mrf.mxu3  ;;  %v698_v53 = vmax.f32 %v597_v49, 0.0 }
 0x117   : > { %v646_v51 = vadd.f32 %v645_v50, %v2815_v45 }
 0x118   : > { %v2859_v58 = vpack.c.bf16 %v698_v53, %v694_v52 }
 0x119   : > { %v699_v55 = vmax.f32 %v646_v51, 0.0 }
 0x11a   : > { %1275 = vmatmul.bf16.gmra.mxu2 %v2859_v58 }
 0x11b   : > { %v2861_v14 = vpack.c.bf16 %v699_v55, %v695_v54  ;;  %v599_v59 = vpop.f32.mrf.mxu2 }
 0x11c   : > { %v600_v7 = vadd.f32 %v599_v59, %v2812_v24 }
 0x11d   : > { %1324 = vmatmul.bf16.gmra.mxu3 %v2861_v14 }
 0x11e   : > { %v648_v61 = vpop.f32.mrf.mxu3  ;;  %v702_v25 = vmax.f32 %v600_v7, 0.0  ;;  %v2467_v7 = vld [vmem:[#allocation3 + $0x184] sm:$0xf] }
 0x11f   : > { %v649_v10 = vadd.f32 %v648_v61, %v2815_v45 }
 0x121   : > { %v2865_v6 = vpop.f32.mrf.mxu0  ;;  %v703_v27 = vmax.f32 %v649_v10, 0.0 }
 0x123   : > { %v601_v12 = vpop.f32.mrf.mxu2 }
 0x124   : > { %v602_v16 = vadd.f32 %v601_v12, %v2812_v24  ;;  %1358 = vmatmul.bf16.vlgmr.msra.gmra.mxu0 %v2733_v1  ;;  %v2881_v1 = vpop.f32.mrf.mxu1  ;;  %v2285_v12 = vld [vmem:[#allocation3 + $0x188] sm:$0xf0] }
 0x125   : > { %1407 = vmatmul.bf16.vlgmr.msra.gmra.mxu1 %v2735_v3  ;;  %v2229_v3 = vld [vmem:[#allocation3 + $0x118] sm:$0xf0] }
 0x126   : > { %v650_v21 = vpop.f32.mrf.mxu3  ;;  %v706_v26 = vmax.f32 %v602_v16, 0.0  ;;  %v2232_v37 = vor.u32 %v2453_v36, %v2229_v3  ;;  %v2288_v16 = vor.u32 %v2467_v7, %v2285_v12 }
 0x127   : > { %v651_v23 = vadd.f32 %v650_v21, %v2815_v45 }
 0x128   : > { %v2873_v29 = vpack.c.bf16 %v706_v26, %v702_v25  ;;  %1454 = vmatpush.bf16.msrb.mxu2 %v2232_v37  ;;  %1504 = vmatpush.bf16.msrb.mxu3 %v2288_v16  ;;  %v2489_v16 = vld [vmem:[%s3282_s5 + $0x30] sm:$0xff] }
 0x129   : > { %v707_v28 = vmax.f32 %v651_v23, 0.0  ;;  %v2875_v32 = vpop.f32.mrf.mxu0 }
 0x12a   : > { %1280 = vmatmul.bf16.gmra.mxu2 %v2873_v29 }
 0x12b   : > { %v2877_v33 = vpack.c.bf16 %v707_v28, %v703_v27  ;;  %v604_v34 = vpop.f32.mrf.mxu2 }
 0x12c   : > { %v605_v48 = vadd.f32 %v604_v34, %v2812_v24  ;;  %v2891_v54 = vpop.f32.mrf.mxu1 }
 0x12d   : > { %1329 = vmatmul.bf16.gmra.mxu3 %v2877_v33 }
 0x12e   : > { %v653_v35 = vpop.f32.mrf.mxu3  ;;  %v710_v55 = vmax.f32 %v605_v48, 0.0 }
 0x12f   : > { %v654_v49 = vadd.f32 %v653_v35, %v2815_v45 }
 0x131   : > { %v2883_v46 = vpop.f32.mrf.mxu0  ;;  %v711_v61 = vmax.f32 %v654_v49, 0.0 }
 0x133   : > { %v606_v50 = vpop.f32.mrf.mxu2 }
 0x134   : > { %v607_v51 = vadd.f32 %v606_v50, %v2812_v24  ;;  %1363 = vmatmul.bf16.gmra.mxu0 %v2755_v39  ;;  %v2901_v21 = vpop.f32.mrf.mxu1 }
 0x135   : > { %1412 = vmatmul.bf16.gmra.mxu1 %v2757_v41  ;;  %v2221_v41 = vld [vmem:[#allocation3 + $0x108] sm:$0xf0] }
 0x136   : > { %v655_v52 = vpop.f32.mrf.mxu3  ;;  %v714_v59 = vmax.f32 %v607_v51, 0.0  ;;  %v2224_v10 = vor.u32 %v2451_v20, %v2221_v41 }
 0x137   : > { %v656_v53 = vadd.f32 %v655_v52, %v2815_v45 }
 0x138   : > { %v2893_v0 = vpack.c.bf16 %v714_v59, %v710_v55  ;;  %1455 = vmatpush.bf16.msrb.mxu2 %v2224_v10 }
 0x139   : > { %v715_v62 = vmax.f32 %v656_v53, 0.0  ;;  %v2895_v2 = vpop.f32.mrf.mxu0 }
 0x13a   : > { %1285 = vmatmul.bf16.gmra.mxu2 %v2893_v0 }
 0x13b   : > { %v2897_v4 = vpack.c.bf16 %v715_v62, %v711_v61  ;;  %v609_v39 = vpop.f32.mrf.mxu2 }
 0x13c   : > { %v610_v25 = vadd.f32 %v609_v39, %v2812_v24  ;;  %v2915_v48 = vpop.f32.mrf.mxu1 }
 0x13d   : > { %1334 = vmatmul.bf16.gmra.mxu3 %v2897_v4 }
 0x13e   : > { %v658_v5 = vpop.f32.mrf.mxu3  ;;  %v718_v36 = vmax.f32 %v610_v25, 0.0 }
 0x13f   : > { %v659_v26 = vadd.f32 %v658_v5, %v2815_v45 }
 0x141   : > { %v2903_v23 = vpop.f32.mrf.mxu0  ;;  %v719_v37 = vmax.f32 %v659_v26, 0.0 }
 0x143   : > { %v611_v27 = vpop.f32.mrf.mxu2 }
 0x144   : > { %v612_v28 = vadd.f32 %v611_v27, %v2812_v24  ;;  %1368 = vmatmul.bf16.gmra.mxu0 %v2777_v11  ;;  %v2923_v53 = vpop.f32.mrf.mxu1 }
 0x145   : > { %1417 = vmatmul.bf16.gmra.mxu1 %v2779_v15 }
 0x146   : > { %v660_v34 = vpop.f32.mrf.mxu3  ;;  %v722_v3 = vmax.f32 %v612_v28, 0.0 }
 0x147   : > { %v661_v35 = vadd.f32 %v660_v34, %v2815_v45 }
 0x148   : > { %v2911_v40 = vpack.c.bf16 %v722_v3, %v718_v36  ;;  %v2485_v3 = vld [vmem:[%s3282_s5 + $0x10] sm:$0xff] }
 0x149   : > { %v723_v38 = vmax.f32 %v661_v35, 0.0  ;;  %v2918_v49 = vpop.f32.mrf.mxu0 }
 0x14a   : > { %1290 = vmatmul.bf16.gmra.mxu2 %v2911_v40 }
 0x14b   : > { %v2913_v43 = vpack.c.bf16 %v723_v38, %v719_v37  ;;  %v614_v11 = vpop.f32.mrf.mxu2  ;;  %v2484_v37 = vld [vmem:[%s3282_s5 + $0x8] sm:$0xff] }
 0x14c   : > { %v615_v15 = vadd.f32 %v614_v11, %v2812_v24 }
 0x14d   : > { %1339 = vmatmul.bf16.gmra.mxu3 %v2913_v43 }
 0x14e   : > { %v663_v50 = vpop.f32.mrf.mxu3  ;;  %v726_v39 = vmax.f32 %v615_v15, 0.0 }
 0x14f   : > { %v664_v51 = vadd.f32 %v663_v50, %v2815_v45  ;;  %v2483_v50 = vld [vmem:[%s3282_s5] sm:$0xff] }
 0x151   : > { %v2927_v61 = vpop.f32.mrf.mxu0  ;;  %v727_v20 = vmax.f32 %v664_v51, 0.0 }
 0x153   : > { %v616_v52 = vpop.f32.mrf.mxu2 }
 0x154   : > { %v617_v55 = vadd.f32 %v616_v52, %v2812_v24  ;;  %1373 = vmatmul.bf16.gmra.mxu0 %v2799_v60  ;;  %v2490_v60 = vld [vmem:[%s3282_s5 + $0x38] sm:$0xff]  ;;  %v2940_v24 = vpop.f32.mrf.mxu1 }
 0x155   : > { %1422 = vmatmul.bf16.gmra.mxu1 %v2801_v63  ;;  %1726 = vmatpush.bf16.msrb.mxu0 %v2490_v60 }
 0x156   : > { %v665_v59 = vpop.f32.mrf.mxu3  ;;  %v730_v5 = vmax.f32 %v617_v55, 0.0  ;;  %v3003_v55 = vld [vmem:[%s3281_s4] sm:$0x3] }
 0x157   : > { %v666_v62 = vadd.f32 %v665_v59, %v2815_v45  ;;  %v2498_v45 = vld [vmem:[%s3282_s5 + $0x78] sm:$0xff] }
 0x158   : > { %v2931_v7 = vpack.c.bf16 %v730_v5, %v726_v39  ;;  %1775 = vmatpush.bf16.msrb.mxu1 %v2498_v45 }
 0x159   : > { %v731_v41 = vmax.f32 %v666_v62, 0.0  ;;  %v2942_v63 = vpop.f32.mrf.mxu0  ;;  %1727 = vmatpush.bf16.msrb.mxu0 %v2489_v16 }
 0x15a   : > { %1295 = vmatmul.bf16.gmra.mxu2 %v2931_v7 }
 0x15b   : > { %v2933_v10 = vpack.c.bf16 %v731_v41, %v727_v20 }
 0x15c   : > { %v2949_v12 = vpop.f32.mrf.mxu1 }
 0x15d   : > { %1344 = vmatmul.bf16.gmra.mxu3 %v2933_v10 }
 0x161   : > { %v2954_v25 = vpop.f32.mrf.mxu0 }
 0x164   : > { %1378 = vmatmul.bf16.gmra.mxu0 %v2743_v13  ;;  %v2488_v13 = vld [vmem:[%s3282_s5 + $0x28] sm:$0xff]  ;;  %v2964_v28 = vpop.f32.mrf.mxu1 }
 0x165   : > { %1427 = vmatmul.bf16.gmra.mxu1 %v2747_v17  ;;  %1728 = vmatpush.bf16.msrb.mxu0 %v2488_v13  ;;  %v2487_v17 = vld [vmem:[%s3282_s5 + $0x20] sm:$0xff] }
 0x169   : > { %1729 = vmatpush.bf16.msrb.mxu0 %v2487_v17  ;;  %v2969_v34 = vpop.f32.mrf.mxu0 }
 0x16a   : > { %1456 = vmatmul.bf16.vlgmr.msrb.gmra.mxu2 %v2823_v22  ;;  %v2497_v22 = vld [vmem:[%s3282_s5 + $0x70] sm:$0xff] }
 0x16b   : > { %1776 = vmatpush.bf16.msrb.mxu1 %v2497_v22 }
 0x16d   : > { %1505 = vmatmul.bf16.vlgmr.msrb.gmra.mxu3 %v2825_v47  ;;  %v1261_v26 = vpop.f32.mrf.mxu2  ;;  %v2486_v47 = vld [vmem:[%s3282_s5 + $0x18] sm:$0xff] }
 0x16e   : > { %1730 = vmatpush.bf16.msrb.mxu0 %v2486_v47 }
 0x170   : > { %v1310_v27 = vpop.f32.mrf.mxu3 }
 0x171   : > { %v2986_v38 = vpop.f32.mrf.mxu0 }
 0x172   : > { %1731 = vmatpush.bf16.msrb.mxu0 %v2485_v3 }
 0x174   : > { %1383 = vmatmul.bf16.gmra.mxu0 %v2765_v56  ;;  %v2981_v56 = vpop.f32.mrf.mxu1 }
 0x175   : > { %1432 = vmatmul.bf16.gmra.mxu1 %v2769_v57  ;;  %v1263_v35 = vpop.f32.mrf.mxu2 }
 0x176   : > { %1732 = vmatpush.bf16.msrb.mxu0 %v2484_v37 }
 0x178   : > { %v1312_v36 = vpop.f32.mrf.mxu3 }
 0x179   : > { %v2998_v52 = vpop.f32.mrf.mxu0 }
 0x17a   : > { %1461 = vmatmul.bf16.gmra.mxu2 %v2835_v42  ;;  %v2496_v42 = vld [vmem:[%s3282_s5 + $0x68] sm:$0xff]  ;;  %1733 = vmatpush.bf16.msrb.mxu0 %v2483_v50 }
 0x17b   : > { %1777 = vmatpush.bf16.msrb.mxu1 %v2496_v42 }
 0x17c   : > { %v2996_v15 = vpop.f32.mrf.mxu1 }
 0x17d   : > { %1510 = vmatmul.bf16.gmra.mxu3 %v2837_v44  ;;  %v1266_v57 = vpop.f32.mrf.mxu2 }
 0x180   : > { %v1315_v11 = vpop.f32.mrf.mxu3 }
 0x181   : > { %v3016_v5 = vpop.f32.mrf.mxu0 }
 0x184   : > { %1388 = vmatmul.bf16.gmra.mxu0 %v2787_v31  ;;  %v3008_v31 = vperm.slane %v3003_v55, 0  ;;  %v3014_v39 = vpop.f32.mrf.mxu1 }
 0x185   : > { %1437 = vmatmul.bf16.gmra.mxu1 %v2791_v18  ;;  %v1268_v44 = vpop.f32.mrf.mxu2 }
 0x186   : > { %v1166_v62 = vadd.f32 %v2875_v32, %v3008_v31  ;;  %v1164_v20 = vadd.f32 %v2865_v6, %v3008_v31 }
 0x188   : > { %v1317_v51 = vpop.f32.mrf.mxu3  ;;  %v1213_v32 = vadd.f32 %v2881_v1, %v1164_v20  ;;  %v1171_v1 = vadd.f32 %v2895_v2, %v3008_v31 }
 0x189   : > { %v3030_v6 = vpop.f32.mrf.mxu0 }
 0x18a   : > { %1466 = vmatmul.bf16.gmra.mxu2 %v2847_v30  ;;  %v2495_v30 = vld [vmem:[%s3282_s5 + $0x60] sm:$0xff]  ;;  %v1262_v16 = vadd.f32 %v1261_v26, %v1213_v32  ;;  %v1169_v26 = vadd.f32 %v2883_v46, %v3008_v31 }
 0x18b   : > { %1778 = vmatpush.bf16.msrb.mxu1 %v2495_v30 }
 0x18c   : > { %v3027_v17 = vpop.f32.mrf.mxu1  ;;  %v1218_v2 = vadd.f32 %v2901_v21, %v1169_v26  ;;  %v1176_v21 = vadd.f32 %v2918_v49, %v3008_v31 }
 0x18d   : > { %1515 = vmatmul.bf16.gmra.mxu3 %v2849_v19  ;;  %v1271_v59 = vpop.f32.mrf.mxu2  ;;  %v1215_v19 = vadd.f32 %v2891_v54, %v1166_v62  ;;  %v1311_v54 = vadd.f32 %v1310_v27, %v1262_v16 }
 0x18e   : > { %v1267_v42 = vadd.f32 %v1266_v57, %v1218_v2  ;;  %v1174_v57 = vadd.f32 %v2903_v23, %v3008_v31 }
 0x18f   : > { %v1264_v60 = vadd.f32 %v1263_v35, %v1215_v19  ;;  %v1546_v47 = vmax.f32 %v1311_v54, 0.0 }
 0x190   : > { %v3010_v18 = vpop.f32.mrf.mxu3  ;;  %v1316_v62 = vadd.f32 %v1315_v11, %v1267_v42  ;;  %v1225_v11 = vadd.f32 %v2940_v24, %v1176_v21 }
 0x191   : > { %v1313_v13 = vadd.f32 %v1312_v36, %v1264_v60  ;;  %v3047_v36 = vpop.f32.mrf.mxu0  ;;  %v1223_v60 = vadd.f32 %v2923_v53, %v1174_v57  ;;  %v1181_v53 = vadd.f32 %v2942_v63, %v3008_v31 }
 0x193   : > { %v1548_v22 = vmax.f32 %v1313_v13, 0.0  ;;  %v1272_v54 = vadd.f32 %v1271_v59, %v1223_v60  ;;  %v1179_v59 = vadd.f32 %v2927_v61, %v3008_v31 }
 0x194   : > { %1393 = vmatmul.bf16.gmra.mxu0 %v2807_v8  ;;  %v3045_v27 = vpop.f32.mrf.mxu1 }
 0x195   : > { %1442 = vmatmul.bf16.gmra.mxu1 %v2809_v9  ;;  %v1273_v41 = vpop.f32.mrf.mxu2  ;;  %v1578_v35 = vpack.c.bf16 %v1548_v22, %v1546_v47  ;;  %v1228_v63 = vadd.f32 %v2949_v12, %v1179_v59  ;;  %v1186_v12 = vadd.f32 %v2969_v34, %v3008_v31 }
 0x196   : > { %v1274_v16 = vadd.f32 %v1273_v41, %v1225_v11 }
 0x198   : > { %v1322_v45 = vpop.f32.mrf.mxu3 }
 0x199   : > { %v3058_v32 = vpop.f32.mrf.mxu0  ;;  %v1323_v23 = vadd.f32 %v1322_v45, %v1274_v16 }
 0x19a   : > { %1471 = vmatmul.bf16.gmra.mxu2 %v2859_v58  ;;  %v2494_v58 = vld [vmem:[%s3282_s5 + $0x58] sm:$0xff] }
 0x19b   : > { %1779 = vmatpush.bf16.msrb.mxu1 %v2494_v58  ;;  %v1556_v47 = vmax.f32 %v1323_v23, 0.0 }
 0x19c   : > { %v3054_v30 = vpop.f32.mrf.mxu1 }
 0x19d   : > { %1520 = vmatmul.bf16.gmra.mxu3 %v2861_v14  ;;  %v3033_v8 = vpop.f32.mrf.mxu2  ;;  %v1220_v14 = vadd.f32 %v2915_v48, %v1171_v1  ;;  %v1321_v1 = vadd.f32 %v3010_v18, %v1272_v54  ;;  %v1230_v18 = vadd.f32 %v2964_v28, %v1181_v53 }
 0x19e   : > { %v1277_v61 = vadd.f32 %v3033_v8, %v1228_v63  ;;  %v1184_v8 = vadd.f32 %v2954_v25, %v3008_v31 }
 0x19f   : > { %v1269_v37 = vadd.f32 %v1268_v44, %v1220_v14  ;;  %v1550_v44 = vmax.f32 %v1316_v62, 0.0  ;;  %v1554_v41 = vmax.f32 %v1321_v1, 0.0 }
 0x1a0   : > { %v3035_v9 = vpop.f32.mrf.mxu3 }
 0x1a1   : > { %v1318_v46 = vadd.f32 %v1317_v51, %v1269_v37  ;;  %v3071_v22 = vpop.f32.mrf.mxu0  ;;  %v1582_v45 = vpack.c.bf16 %v1556_v47, %v1554_v41  ;;  %v1326_v42 = vadd.f32 %v3035_v9, %v1277_v61  ;;  %v1235_v9 = vadd.f32 %v2996_v15, %v1186_v12 }
 0x1a2   : > { %v3131_v41 = vperm.slane %v3003_v55, 1 }
 0x1a3   : > { %v1552_v48 = vmax.f32 %v1318_v46, 0.0 }
 0x1a4   : > { %1734 = vmatmul.bf16.vlgmr.msrb.gmra.mxu0 %v1578_v35  ;;  %v3069_v49 = vpop.f32.mrf.mxu1 }
 0x1a5   : > { %v1278_v3 = vpop.f32.mrf.mxu2 }
 0x1a6   : > { %v1279_v14 = vadd.f32 %v1278_v3, %v1230_v18  ;;  %v1558_v3 = vmax.f32 %v1326_v42, 0.0 }
 0x1a8   : > { %v1327_v50 = vpop.f32.mrf.mxu3 }
 0x1a9   : > { %v1328_v37 = vadd.f32 %v1327_v50, %v1279_v14 }
 0x1aa   : > { %1476 = vmatmul.bf16.gmra.mxu2 %v2873_v29  ;;  %v1580_v29 = vpack.c.bf16 %v1552_v48, %v1550_v44  ;;  %v1233_v44 = vadd.f32 %v2981_v56, %v1184_v8  ;;  %v1191_v56 = vadd.f32 %v2998_v52, %v3008_v31 }
 0x1ab   : > { %v1560_v48 = vmax.f32 %v1328_v37, 0.0 }
 0x1ac   : > { %v3082_v35 = vpop.f32.mrf.mxu1 }
 0x1ad   : > { %1525 = vmatmul.bf16.gmra.mxu3 %v2877_v33  ;;  %v3052_v20 = vpop.f32.mrf.mxu2  ;;  %v2493_v33 = vld [vmem:[%s3282_s5 + $0x50] sm:$0xff] }
 0x1ae   : > { %1780 = vmatpush.bf16.msrb.mxu1 %v2493_v33  ;;  %v1282_v11 = vadd.f32 %v3052_v20, %v1233_v44  ;;  %v1189_v20 = vadd.f32 %v2986_v38, %v3008_v31  ;;  %v1360_v38 = vadd.f32 %v3071_v22, %v3131_v41 }
 0x1b0   : > { %v3056_v19 = vpop.f32.mrf.mxu3 }
 0x1b1   : > { %v1331_v60 = vadd.f32 %v3056_v19, %v1282_v11 }
 0x1b4   : > { %1739 = vmatmul.bf16.gmra.mxu0 %v1580_v29  ;;  %v1408_v46 = vpop.f32.mrf.mxu1 }
 0x1b5   : > { %v1283_v51 = vpop.f32.mrf.mxu2 }
 0x1b6   : > { %v1284_v29 = vadd.f32 %v1283_v51, %v1235_v9  ;;  %v1562_v51 = vmax.f32 %v1331_v60, 0.0 }
 0x1b8   : > { %v1332_v13 = vpop.f32.mrf.mxu3 }
 0x1b9   : > { %v1333_v25 = vadd.f32 %v1332_v13, %v1284_v29  ;;  %v1238_v13 = vadd.f32 %v3014_v39, %v1189_v20  ;;  %v1196_v39 = vadd.f32 %v3030_v6, %v3008_v31 }
 0x1ba   : > { %1481 = vmatmul.bf16.gmra.mxu2 %v2893_v0  ;;  %v2492_v0 = vld [vmem:[%s3282_s5 + $0x48] sm:$0xff] }
 0x1bb   : > { %1781 = vmatpush.bf16.msrb.mxu1 %v2492_v0  ;;  %v1564_v16 = vmax.f32 %v1333_v25, 0.0  ;;  %v1245_v22 = vadd.f32 %v3054_v30, %v1196_v39 }
 0x1bc   : > { %v1410_v57 = vpop.f32.mrf.mxu1 }
 0x1bd   : > { %1530 = vmatmul.bf16.gmra.mxu3 %v2897_v4  ;;  %v1286_v24 = vpop.f32.mrf.mxu2  ;;  %v3087_v4 = vpop.f32.mrf.mxu0 }
 0x1be   : > { %v1287_v52 = vadd.f32 %v1286_v24, %v1238_v13  ;;  %v1362_v55 = vadd.f32 %v3087_v4, %v3131_v41 }
 0x1c0   : > { %v3076_v26 = vpop.f32.mrf.mxu3  ;;  %v1411_v42 = vadd.f32 %v1410_v57, %v1362_v55 }
 0x1c4   : > { %1744 = vmatmul.bf16.gmra.mxu0 %v1582_v45  ;;  %v1413_v23 = vpop.f32.mrf.mxu1 }
 0x1c5   : > { %v1288_v58 = vpop.f32.mrf.mxu2  ;;  %v3095_v62 = vpop.f32.mrf.mxu0 }
 0x1c6   : > { %v1365_v30 = vadd.f32 %v3095_v62, %v3131_v41  ;;  %v1199_v62 = vadd.f32 %v3047_v36, %v3008_v31 }
 0x1c8   : > { %v1337_v2 = vpop.f32.mrf.mxu3  ;;  %v1248_v13 = vadd.f32 %v3069_v49, %v1199_v62 }
 0x1ca   : > { %1486 = vmatmul.bf16.gmra.mxu2 %v2911_v40  ;;  %v1584_v40 = vpack.c.bf16 %v1560_v48, %v1558_v3 }
 0x1cc   : > { %v1415_v59 = vpop.f32.mrf.mxu1 }
 0x1cd   : > { %1535 = vmatmul.bf16.gmra.mxu3 %v2913_v43  ;;  %v3097_v28 = vpop.f32.mrf.mxu2  ;;  %v2491_v43 = vld [vmem:[%s3282_s5 + $0x40] sm:$0xff]  ;;  %v3110_v34 = vpop.f32.mrf.mxu0 }
 0x1ce   : > { %1782 = vmatpush.bf16.msrb.mxu1 %v2491_v43 }
 0x1d0   : > { %v3099_v21 = vpop.f32.mrf.mxu3 }
 0x1d4   : > { %1749 = vmatmul.bf16.gmra.mxu0 %v1584_v40 }
 0x1d5   : > { %v1293_v50 = vpop.f32.mrf.mxu2  ;;  %v3122_v1 = vpop.f32.mrf.mxu0 }
 0x1d8   : > { %v1342_v33 = vpop.f32.mrf.mxu3 }
 0x1da   : > { %1491 = vmatmul.bf16.gmra.mxu2 %v2931_v7  ;;  %v1586_v7 = vpack.c.bf16 %v1564_v16, %v1562_v51  ;;  %v1201_v16 = vadd.f32 %v3058_v32, %v3008_v31 }
 0x1dc   : > { %v1250_v20 = vadd.f32 %v3082_v35, %v1201_v16  ;;  %v1370_v35 = vadd.f32 %v3122_v1, %v3131_v41 }
 0x1dd   : > { %1540 = vmatmul.bf16.gmra.mxu3 %v2933_v10  ;;  %v3116_v15 = vpop.f32.mrf.mxu2  ;;  %v1240_v10 = vadd.f32 %v3027_v17, %v1191_v56  ;;  %v3133_v0 = vpop.f32.mrf.mxu0  ;;  %v1336_v17 = vadd.f32 %v3076_v26, %v1287_v52 }
 0x1de   : > { %v1418_v26 = vpop.f32.mrf.mxu1 }
 0x1df   : > { %v1289_v47 = vadd.f32 %v1288_v58, %v1240_v10  ;;  %v1409_v58 = vadd.f32 %v1408_v46, %v1360_v38  ;;  %v1566_v24 = vmax.f32 %v1336_v17, 0.0  ;;  %v1294_v46 = vadd.f32 %v1293_v50, %v1245_v22 }
 0x1e0   : > { %v3118_v54 = vpop.f32.mrf.mxu3  ;;  %v1419_v39 = vadd.f32 %v1418_v26, %v1370_v35 }
 0x1e1   : > { %v1338_v45 = vadd.f32 %v1337_v2, %v1289_v47  ;;  %v1194_v2 = vadd.f32 %v3016_v5, %v3008_v31  ;;  %v1343_v5 = vadd.f32 %v1342_v33, %v1294_v46  ;;  %v1367_v33 = vadd.f32 %v3110_v34, %v3131_v41 }
 0x1e2   : > { %v1297_v34 = vadd.f32 %v3116_v15, %v1248_v13  ;;  %v1372_v15 = vadd.f32 %v3133_v0, %v3131_v41 }
 0x1e3   : > { %v1568_v63 = vmax.f32 %v1338_v45, 0.0  ;;  %v1243_v6 = vadd.f32 %v3045_v27, %v1194_v2  ;;  %v1572_v60 = vmax.f32 %v1343_v5, 0.0 }
 0x1e4   : > { %1754 = vmatmul.bf16.gmra.mxu0 %v1586_v7  ;;  %v1416_v7 = vadd.f32 %v1415_v59, %v1367_v33  ;;  %v1346_v59 = vadd.f32 %v3118_v54, %v1297_v34 }
 0x1e5   : > { %v1298_v19 = vpop.f32.mrf.mxu2  ;;  %v1588_v61 = vpack.c.bf16 %v1568_v63, %v1566_v24  ;;  %v3145_v48 = vpop.f32.mrf.mxu0  ;;  %v1292_v40 = vadd.f32 %v3097_v28, %v1243_v6  ;;  %v1414_v28 = vadd.f32 %v1413_v23, %v1365_v30 }
 0x1e6   : > { %v1420_v25 = vpop.f32.mrf.mxu1  ;;  %v1299_v47 = vadd.f32 %v1298_v19, %v1250_v20  ;;  %v1375_v26 = vadd.f32 %v3145_v48, %v3131_v41 }
 0x1e7   : > { %v1341_v57 = vadd.f32 %v3099_v21, %v1292_v40 }
 0x1e8   : > { %v3128_v53 = vpop.f32.mrf.mxu3 }
 0x1e9   : > { %v1570_v56 = vmax.f32 %v1341_v57, 0.0  ;;  %v1348_v31 = vadd.f32 %v3128_v53, %v1299_v47 }
 0x1eb   : > { %v1590_v51 = vpack.c.bf16 %v1572_v60, %v1570_v56  ;;  %v1576_v19 = vmax.f32 %v1348_v31, 0.0 }
 0x1ed   : > { %v1457_v18 = vpop.f32.mrf.mxu2  ;;  %v1376_v50 = vpop.f32.mrf.mxu0 }
 0x1ee   : > { %v1458_v37 = vadd.f32 %v1457_v18, %v1409_v58  ;;  %v1423_v45 = vpop.f32.mrf.mxu1  ;;  %v1574_v58 = vmax.f32 %v1346_v59, 0.0 }
 0x1ef   : > { %v1424_v40 = vadd.f32 %v1423_v45, %v1375_v26 }
 0x1f0   : > { %v1506_v14 = vpop.f32.mrf.mxu3  ;;  %v1592_v24 = vpack.c.bf16 %v1576_v19, %v1574_v58 }
 0x1f1   : > { %v1507_v3 = vadd.f32 %v1506_v14, %v1458_v37 }
 0x1f3   : > { %v1547_v9 = vmax.f32 %v1507_v3, 0.0 }
 0x1f4   : > { %1759 = vmatmul.bf16.gmra.mxu0 %v1588_v61  ;;  %v1421_v61 = vadd.f32 %v1420_v25, %v1372_v15 }
 0x1f5   : > { %v1459_v12 = vpop.f32.mrf.mxu2  ;;  %v1379_v17 = vpop.f32.mrf.mxu0 }
 0x1f6   : > { %v1460_v8 = vadd.f32 %v1459_v12, %v1411_v42  ;;  %v1425_v55 = vpop.f32.mrf.mxu1  ;;  %v1380_v16 = vadd.f32 %v1379_v17, %v3131_v41 }
 0x1f8   : > { %v1508_v4 = vpop.f32.mrf.mxu3 }
 0x1f9   : > { %v1509_v43 = vadd.f32 %v1508_v4, %v1460_v8 }
 0x1fb   : > { %v1549_v44 = vmax.f32 %v1509_v43, 0.0  ;;  %v1377_v43 = vadd.f32 %v1376_v50, %v3131_v41 }
 0x1fd   : > { %v1579_v29 = vpack.c.bf16 %v1549_v44, %v1547_v9  ;;  %v1462_v11 = vpop.f32.mrf.mxu2  ;;  %v1381_v2 = vpop.f32.mrf.mxu0  ;;  %v1426_v9 = vadd.f32 %v1425_v55, %v1377_v43 }
 0x1fe   : > { %v1463_v21 = vadd.f32 %v1462_v11, %v1414_v28  ;;  %v1428_v46 = vpop.f32.mrf.mxu1  ;;  %v1382_v50 = vadd.f32 %v1381_v2, %v3131_v41 }
 0x1ff   : > { %1783 = vmatmul.bf16.vlgmr.msrb.gmra.mxu1 %v1579_v29  ;;  %v1429_v62 = vadd.f32 %v1428_v46, %v1380_v16 }
 0x200   : > { %v1511_v27 = vpop.f32.mrf.mxu3 }
 0x201   : > { %v1512_v52 = vadd.f32 %v1511_v27, %v1463_v21 }
 0x203   : > { %v1551_v36 = vmax.f32 %v1512_v52, 0.0 }
 0x204   : > { %1764 = vmatmul.bf16.gmra.mxu0 %v1590_v51 }
 0x205   : > { %v1464_v10 = vpop.f32.mrf.mxu2  ;;  %v1384_v0 = vpop.f32.mrf.mxu0 }
 0x206   : > { %v1465_v32 = vadd.f32 %v1464_v10, %v1416_v7  ;;  %v1430_v30 = vpop.f32.mrf.mxu1  ;;  %v1385_v17 = vadd.f32 %v1384_v0, %v3131_v41 }
 0x207   : > { %v1431_v7 = vadd.f32 %v1430_v30, %v1382_v50 }
 0x208   : > { %v1513_v23 = vpop.f32.mrf.mxu3 }
 0x209   : > { %v1514_v38 = vadd.f32 %v1513_v23, %v1465_v32 }
 0x20b   : > { %v1553_v18 = vmax.f32 %v1514_v38, 0.0 }
 0x20d   : > { %v1581_v63 = vpack.c.bf16 %v1553_v18, %v1551_v36  ;;  %v1467_v49 = vpop.f32.mrf.mxu2  ;;  %v1386_v25 = vpop.f32.mrf.mxu0 }
 0x20e   : > { %v1468_v53 = vadd.f32 %v1467_v49, %v1419_v39  ;;  %v1433_v51 = vpop.f32.mrf.mxu1  ;;  %v1387_v59 = vadd.f32 %v1386_v25, %v3131_v41 }
 0x20f   : > { %1788 = vmatmul.bf16.gmra.mxu1 %v1581_v63  ;;  %v1434_v35 = vadd.f32 %v1433_v51, %v1385_v17 }
 0x210   : > { %v1516_v14 = vpop.f32.mrf.mxu3 }
 0x211   : > { %v1517_v1 = vadd.f32 %v1516_v14, %v1468_v53 }
 0x213   : > { %v1555_v12 = vmax.f32 %v1517_v1, 0.0 }
 0x214   : > { %1769 = vmatmul.bf16.gmra.mxu0 %v1592_v24 }
 0x215   : > { %v1469_v37 = vpop.f32.mrf.mxu2  ;;  %v1389_v21 = vpop.f32.mrf.mxu0 }
 0x216   : > { %v1470_v22 = vadd.f32 %v1469_v37, %v1421_v61  ;;  %v1435_v23 = vpop.f32.mrf.mxu1  ;;  %v1390_v61 = vadd.f32 %v1389_v21, %v3131_v41 }
 0x217   : > { %v1436_v49 = vadd.f32 %v1435_v23, %v1387_v59  ;;  %v3187_v23 = vld [vmem:[%s3284_s7] ss:$0 sm:$0xff] }
 0x218   : > { %v1518_v54 = vpop.f32.mrf.mxu3 }
 0x219   : > { %v1519_v42 = vadd.f32 %v1518_v54, %v1470_v22 }
 0x21b   : > { %v1557_v6 = vmax.f32 %v1519_v42, 0.0 }
 0x21d   : > { %v1583_v3 = vpack.c.bf16 %v1557_v6, %v1555_v12  ;;  %v1472_v8 = vpop.f32.mrf.mxu2  ;;  %v1391_v38 = vpop.f32.mrf.mxu0 }
 0x21e   : > { %v1473_v5 = vadd.f32 %v1472_v8, %v1424_v40  ;;  %v1438_v19 = vpop.f32.mrf.mxu1  ;;  %v1392_v6 = vadd.f32 %v1391_v38, %v3131_v41 }
 0x21f   : > { %1793 = vmatmul.bf16.gmra.mxu1 %v1583_v3  ;;  %v1439_v12 = vadd.f32 %v1438_v19, %v1390_v61 }
 0x220   : > { %v1521_v4 = vpop.f32.mrf.mxu3 }
 0x221   : > { %v1522_v57 = vadd.f32 %v1521_v4, %v1473_v5 }
 0x223   : > { %v1559_v27 = vmax.f32 %v1522_v57, 0.0 }
 0x225   : > { %v1474_v44 = vpop.f32.mrf.mxu2  ;;  %v1394_v14 = vpop.f32.mrf.mxu0 }
 0x226   : > { %v1475_v29 = vadd.f32 %v1474_v44, %v1426_v9  ;;  %v1440_v54 = vpop.f32.mrf.mxu1  ;;  %v1395_v30 = vadd.f32 %v1394_v14, %v3131_v41 }
 0x227   : > { %v1441_v46 = vadd.f32 %v1440_v54, %v1392_v6 }
 0x228   : > { %v1523_v11 = vpop.f32.mrf.mxu3 }
 0x229   : > { %v1524_v60 = vadd.f32 %v1523_v11, %v1475_v29 }
 0x22b   : > { %v1561_v48 = vmax.f32 %v1524_v60, 0.0 }
 0x22d   : > { %v1585_v28 = vpack.c.bf16 %v1561_v48, %v1559_v27  ;;  %v1477_v33 = vpop.f32.mrf.mxu2  ;;  %v1396_v42 = vpop.f32.mrf.mxu0 }
 0x22e   : > { %v1478_v20 = vadd.f32 %v1477_v33, %v1429_v62  ;;  %v1443_v43 = vpop.f32.mrf.mxu1  ;;  %v1397_v60 = vadd.f32 %v1396_v42, %v3131_v41 }
 0x22f   : > { %1798 = vmatmul.bf16.gmra.mxu1 %v1585_v28  ;;  %v1444_v25 = vadd.f32 %v1443_v43, %v1395_v30 }
 0x230   : > { %v1526_v56 = vpop.f32.mrf.mxu3 }
 0x231   : > { %v1527_v13 = vadd.f32 %v1526_v56, %v1478_v20 }
 0x233   : > { %v1563_v45 = vmax.f32 %v1527_v13, 0.0  ;;  %v3181_v13 = vld [vmem:[%s3283_s6] ss:$0 sm:$0xff] }
 0x235   : > { %v1479_v10 = vpop.f32.mrf.mxu2  ;;  %v1735_v5 = vpop.f32.mrf.mxu0 }
 0x236   : > { %v1480_v47 = vadd.f32 %v1479_v10, %v1431_v7  ;;  %v1445_v48 = vpop.f32.mrf.mxu1 }
 0x237   : > { %v1446_v28 = vadd.f32 %v1445_v48, %v1397_v60 }
 0x238   : > { %v1528_v52 = vpop.f32.mrf.mxu3 }
 0x239   : > { %v1529_v32 = vadd.f32 %v1528_v52, %v1480_v47  ;;  %v1736_v47 = vadd.f32 %v3181_v13, %v1735_v5 }
 0x23b   : > { %v1565_v34 = vmax.f32 %v1529_v32, 0.0 }
 0x23d   : > { %v1587_v31 = vpack.c.bf16 %v1565_v34, %v1563_v45  ;;  %v1482_v36 = vpop.f32.mrf.mxu2  ;;  %v1737_v16 = vpop.f32.mrf.mxu0 }
 0x23e   : > { %v1483_v63 = vadd.f32 %v1482_v36, %v1434_v35  ;;  %v1738_v17 = vadd.f32 %v3181_v13, %v1737_v16 }
 0x23f   : > { %1803 = vmatmul.bf16.gmra.mxu1 %v1587_v31 }
 0x240   : > { %v1531_v18 = vpop.f32.mrf.mxu3 }
 0x241   : > { %v1532_v15 = vadd.f32 %v1531_v18, %v1483_v63 }
 0x243   : > { %v1567_v53 = vmax.f32 %v1532_v15, 0.0 }
 0x245   : > { %v1484_v39 = vpop.f32.mrf.mxu2  ;;  %v1740_v10 = vpop.f32.mrf.mxu0 }
 0x246   : > { %v1485_v58 = vadd.f32 %v1484_v39, %v1436_v49  ;;  %v1741_v63 = vadd.f32 %v3181_v13, %v1740_v10 }
 0x248   : > { %v1533_v55 = vpop.f32.mrf.mxu3 }
 0x249   : > { %v1534_v24 = vadd.f32 %v1533_v55, %v1485_v58 }
 0x24b   : > { %v1569_v2 = vmax.f32 %v1534_v24, 0.0 }
 0x24d   : > { %v1589_v37 = vpack.c.bf16 %v1569_v2, %v1567_v53  ;;  %v1487_v1 = vpop.f32.mrf.mxu2  ;;  %v1742_v41 = vpop.f32.mrf.mxu0 }
 0x24e   : > { %v1488_v26 = vadd.f32 %v1487_v1, %v1439_v12  ;;  %v1743_v55 = vadd.f32 %v3181_v13, %v1742_v41 }
 0x24f   : > { %1808 = vmatmul.bf16.gmra.mxu1 %v1589_v37 }
 0x250   : > { %v1536_v22 = vpop.f32.mrf.mxu3 }
 0x251   : > { %v1537_v0 = vadd.f32 %v1536_v22, %v1488_v26 }
 0x253   : > { %v1571_v9 = vmax.f32 %v1537_v0, 0.0 }
 0x255   : > { %v1489_v3 = vpop.f32.mrf.mxu2  ;;  %v1745_v38 = vpop.f32.mrf.mxu0 }
 0x256   : > { %v1490_v8 = vadd.f32 %v1489_v3, %v1441_v46  ;;  %v1746_v22 = vadd.f32 %v3181_v13, %v1745_v38 }
 0x258   : > { %v1538_v4 = vpop.f32.mrf.mxu3 }
 0x259   : > { %v1539_v40 = vadd.f32 %v1538_v4, %v1490_v8 }
 0x25b   : > { %v1573_v44 = vmax.f32 %v1539_v40, 0.0 }
 0x25d   : > { %v1591_v57 = vpack.c.bf16 %v1573_v44, %v1571_v9  ;;  %v1492_v29 = vpop.f32.mrf.mxu2  ;;  %v1747_v19 = vpop.f32.mrf.mxu0 }
 0x25e   : > { %v1493_v27 = vadd.f32 %v1492_v29, %v1444_v25  ;;  %v1748_v3 = vadd.f32 %v3181_v13, %v1747_v19 }
 0x25f   : > { %1813 = vmatmul.bf16.gmra.mxu1 %v1591_v57 }
 0x260   : > { %v1541_v11 = vpop.f32.mrf.mxu3 }
 0x261   : > { %v1542_v56 = vadd.f32 %v1541_v11, %v1493_v27 }
 0x263   : > { %v1575_v21 = vmax.f32 %v1542_v56, 0.0 }
 0x265   : > { %v1494_v33 = vpop.f32.mrf.mxu2  ;;  %v1750_v61 = vpop.f32.mrf.mxu0 }
 0x266   : > { %v1495_v62 = vadd.f32 %v1494_v33, %v1446_v28  ;;  %v1751_v9 = vadd.f32 %v3181_v13, %v1750_v61 }
 0x268   : > { %v1543_v50 = vpop.f32.mrf.mxu3 }
 0x269   : > { %v1544_v51 = vadd.f32 %v1543_v50, %v1495_v62 }
 0x26b   : > { %v1577_v20 = vmax.f32 %v1544_v51, 0.0 }
 0x26d   : > { %v1593_v7 = vpack.c.bf16 %v1577_v20, %v1575_v21  ;;  %v1752_v26 = vpop.f32.mrf.mxu0 }
 0x26e   : > { %v1753_v25 = vadd.f32 %v3181_v13, %v1752_v26 }
 0x26f   : > { %1818 = vmatmul.bf16.gmra.mxu1 %v1593_v7 }
 0x275   : > { %v1755_v5 = vpop.f32.mrf.mxu0 }
 0x276   : > { %v1756_v56 = vadd.f32 %v3181_v13, %v1755_v5 }
 0x27c   : > { %v1784_v52 = vpop.f32.mrf.mxu1 }
 0x27d   : > { %v1785_v32 = vadd.f32 %v1784_v52, %v1736_v47  ;;  %v1757_v27 = vpop.f32.mrf.mxu0 }
 0x27e   : > { %v1758_v10 = vadd.f32 %v3181_v13, %v1757_v27 }
 0x27f   : > { %v1824_v45 = vmax.f32 %v1785_v32, 0.0 }
 0x281   : > { %v1844_v34 = vmul.f32 %v3187_v23, %v1824_v45 }
 0x283   : > { %v1861_v31 = vsel %vm1860_vm2, %v1844_v34, 0.0 }
 0x284   : > { %v1786_v36 = vpop.f32.mrf.mxu1  ;;  %1862 = vadd.xlane.f32.xlu0 %v1861_v31 }
 0x285   : > { %v1787_v18 = vadd.f32 %v1786_v36, %v1738_v17  ;;  %v1760_v21 = vpop.f32.mrf.mxu0 }
 0x286   : > { %v1761_v38 = vadd.f32 %v3181_v13, %v1760_v21 }
 0x287   : > { %v1825_v35 = vmax.f32 %v1787_v18, 0.0 }
 0x289   : > { %v1845_v59 = vmul.f32 %v3187_v23, %v1825_v35 }
 0x28b   : > { %v1864_v49 = vsel %vm1860_vm2, %v1845_v59, 0.0 }
 0x28c   : > { %v1789_v14 = vpop.f32.mrf.mxu1  ;;  %1865 = vadd.xlane.f32.xlu0 %v1864_v49 }
 0x28d   : > { %v1790_v39 = vadd.f32 %v1789_v14, %v1741_v63  ;;  %v1762_v45 = vpop.f32.mrf.mxu0 }
 0x28e   : > { %v1763_v63 = vadd.f32 %v3181_v13, %v1762_v45 }
 0x28f   : > { %v1826_v15 = vmax.f32 %v1790_v39, 0.0 }
 0x291   : > { %v1846_v58 = vmul.f32 %v3187_v23, %v1826_v15 }
 0x293   : > { %v1867_v24 = vsel %vm1860_vm2, %v1846_v58, 0.0 }
 0x294   : > { %v1791_v53 = vpop.f32.mrf.mxu1  ;;  %1868 = vadd.xlane.f32.xlu1 %v1867_v24 }
 0x295   : > { %v1792_v2 = vadd.f32 %v1791_v53, %v1743_v55  ;;  %v1765_v59 = vpop.f32.mrf.mxu0 }
 0x296   : > { %v1766_v58 = vadd.f32 %v3181_v13, %v1765_v59 }
 0x297   : > { %v1827_v37 = vmax.f32 %v1792_v2, 0.0 }
 0x299   : > { %v1847_v1 = vmul.f32 %v3187_v23, %v1827_v37 }
 0x29b   : > { %v1870_v54 = vsel %vm1860_vm2, %v1847_v1, 0.0 }
 0x29c   : > { %v1794_v42 = vpop.f32.mrf.mxu1  ;;  %1871 = vadd.xlane.f32.xlu1 %v1870_v54 }
 0x29d   : > { %v1795_v12 = vadd.f32 %v1794_v42, %v1746_v22  ;;  %v1767_v24 = vpop.f32.mrf.mxu0 }
 0x29e   : > { %v1768_v1 = vadd.f32 %v3181_v13, %v1767_v24 }
 0x29f   : > { %v1828_v6 = vmax.f32 %v1795_v12, 0.0 }
 0x2a1   : > { %v1848_v46 = vmul.f32 %v3187_v23, %v1828_v6 }
 0x2a3   : > { %v1873_v0 = vsel %vm1860_vm2, %v1848_v46, 0.0 }
 0x2a4   : > { %v1796_v8 = vpop.f32.mrf.mxu1  ;;  %1874 = vadd.xlane.f32.xlu2 %v1873_v0 }
 0x2a5   : > { %v1797_v4 = vadd.f32 %v1796_v8, %v1748_v3  ;;  %v1770_v12 = vpop.f32.mrf.mxu0 }
 0x2a6   : > { %v1771_v46 = vadd.f32 %v3181_v13, %v1770_v12 }
 0x2a7   : > { %v1829_v40 = vmax.f32 %v1797_v4, 0.0 }
 0x2a9   : > { %v1849_v43 = vmul.f32 %v3187_v23, %v1829_v40 }
 0x2ab   : > { %v1876_v44 = vsel %vm1860_vm2, %v1849_v43, 0.0 }
 0x2ac   : > { %v1799_v30 = vpop.f32.mrf.mxu1  ;;  %1877 = vadd.xlane.f32.xlu2 %v1876_v44 }
 0x2ad   : > { %v1800_v57 = vadd.f32 %v1799_v30, %v1751_v9  ;;  %v1772_v40 = vpop.f32.mrf.mxu0  ;;  %v2524_v30 = vld [vmem:[#allocation2] ss:$0 sm:$0xff] }
 0x2ae   : > { %v1773_v5 = vadd.f32 %v3181_v13, %v1772_v40 }
 0x2af   : > { %v1830_v29 = vmax.f32 %v1800_v57, 0.0 }
 0x2b1   : > { %v1850_v11 = vmul.f32 %v3187_v23, %v1830_v29 }
 0x2b3   : > { %v1879_v60 = vsel %vm1860_vm2, %v1850_v11, 0.0 }
 0x2b4   : > { %v1801_v48 = vpop.f32.mrf.mxu1  ;;  %1880 = vadd.xlane.f32.xlu0 %v1879_v60 }
 0x2b5   : > { %v1802_v16 = vadd.f32 %v1801_v48, %v1753_v25 }
 0x2b7   : > { %v1831_v28 = vmax.f32 %v1802_v16, 0.0 }
 0x2b9   : > { %v1851_v33 = vmul.f32 %v3187_v23, %v1831_v28 }
 0x2bb   : > { %v1882_v62 = vsel %vm1860_vm2, %v1851_v33, 0.0 }
 0x2bc   : > { %v1804_v50 = vpop.f32.mrf.mxu1  ;;  %1883 = vadd.xlane.f32.xlu1 %v1882_v62 }
 0x2bd   : > { %v1805_v51 = vadd.f32 %v1804_v50, %v1756_v56 }
 0x2bf   : > { %v1832_v20 = vmax.f32 %v1805_v51, 0.0 }
 0x2c1   : > { %v1852_v7 = vmul.f32 %v3187_v23, %v1832_v20 }
 0x2c3   : > { %v1885_v41 = vsel %vm1860_vm2, %v1852_v7, 0.0 }
 0x2c4   : > { %v1806_v47 = vpop.f32.mrf.mxu1  ;;  %1886 = vadd.xlane.f32.xlu2 %v1885_v41 }
 0x2c5   : > { %v1807_v52 = vadd.f32 %v1806_v47, %v1758_v10 }
 0x2c7   : > { %v1833_v32 = vmax.f32 %v1807_v52, 0.0 }
 0x2c9   : > { %v1853_v34 = vmul.f32 %v3187_v23, %v1833_v32 }
 0x2cb   : > { %v1888_v17 = vsel %vm1860_vm2, %v1853_v34, 0.0 }
 0x2cc   : > { %v1809_v31 = vpop.f32.mrf.mxu1  ;;  %1889 = vadd.xlane.f32.xlu0 %v1888_v17 }
 0x2cd   : > { %v1810_v36 = vadd.f32 %v1809_v31, %v1761_v38 }
 0x2cf   : > { %v1834_v18 = vmax.f32 %v1810_v36, 0.0 }
 0x2d1   : > { %v1854_v35 = vmul.f32 %v3187_v23, %v1834_v18 }
 0x2d3   : > { %v1891_v49 = vsel %vm1860_vm2, %v1854_v35, 0.0 }
 0x2d4   : > { %v1811_v19 = vpop.f32.mrf.mxu1  ;;  %1892 = vadd.xlane.f32.xlu1 %v1891_v49 }
 0x2d5   : > { %v1812_v14 = vadd.f32 %v1811_v19, %v1763_v63 }
 0x2d7   : > { %v1835_v39 = vmax.f32 %v1812_v14, 0.0 }
 0x2d9   : > { %v1855_v15 = vmul.f32 %v3187_v23, %v1835_v39 }
 0x2db   : > { %v1894_v55 = vsel %vm1860_vm2, %v1855_v15, 0.0 }
 0x2dc   : > { %v1814_v53 = vpop.f32.mrf.mxu1  ;;  %1895 = vadd.xlane.f32.xlu2 %v1894_v55 }
 0x2dd   : > { %v1815_v2 = vadd.f32 %v1814_v53, %v1766_v58 }
 0x2df   : > { %v1836_v61 = vmax.f32 %v1815_v2, 0.0 }
 0x2e1   : > { %v1856_v37 = vmul.f32 %v3187_v23, %v1836_v61 }
 0x2e3   : > { %v1897_v22 = vsel %vm1860_vm2, %v1856_v37, 0.0 }
 0x2e4   : > { %v1816_v54 = vpop.f32.mrf.mxu1  ;;  %1898 = vadd.xlane.f32.xlu0 %v1897_v22 }
 0x2e5   : > { %v1817_v42 = vadd.f32 %v1816_v54, %v1768_v1 }
 0x2e7   : > { %v1837_v6 = vmax.f32 %v1817_v42, 0.0 }
 0x2e9   : > { %v1857_v26 = vmul.f32 %v3187_v23, %v1837_v6 }
 0x2eb   : > { %v1900_v3 = vsel %vm1860_vm2, %v1857_v26, 0.0 }
 0x2ec   : > { %v1819_v0 = vpop.f32.mrf.mxu1  ;;  %1901 = vadd.xlane.f32.xlu1 %v1900_v3 }
 0x2ed   : > { %v1820_v8 = vadd.f32 %v1819_v0, %v1771_v46 }
 0x2ef   : > { %v1838_v4 = vmax.f32 %v1820_v8, 0.0 }
 0x2f1   : > { %v1858_v43 = vmul.f32 %v3187_v23, %v1838_v4 }
 0x2f3   : > { %v1903_v9 = vsel %vm1860_vm2, %v1858_v43, 0.0 }
 0x2f4   : > { %v1821_v44 = vpop.f32.mrf.mxu1  ;;  %1904 = vadd.xlane.f32.xlu2 %v1903_v9 }
 0x2f5   : > { %v1822_v57 = vadd.f32 %v1821_v44, %v1773_v5 }
 0x2f7   : > { %v1839_v29 = vmax.f32 %v1822_v57, 0.0  ;;  %v1863_v11 = vpop.xlane.xlu0 %1862 }
 0x2f8   : > { %v1913_v13 = vadd.f32 %v2524_v30, %v1863_v11 }
 0x2f9   : > { %v1859_v25 = vmul.f32 %v3187_v23, %v1839_v29 }
 0x2fa   : > { %1930 = vst.msk [vmem:[%s3238_s10] sm:$0xff] %vm1929_vm3, %v1913_v13 }
 0x2fb   : > { %v1906_v60 = vsel %vm1860_vm2, %v1859_v25, 0.0 }
 0x2fc   : > { %1907 = vadd.xlane.f32.xlu0 %v1906_v60 }
 0x2ff   : > { %v1866_v27 = vpop.xlane.xlu0 %1865 }
 0x300   : > { %v1914_v48 = vadd.f32 %v2524_v30, %v1866_v27 }
 0x302   : > { %1931 = vst.msk [vmem:[%s3238_s10 + $0x8] sm:$0xff] %vm1929_vm3, %v1914_v48 }
 0x307   : > { %v1869_v16 = vpop.xlane.xlu1 %1868 }
 0x308   : > { %v1915_v28 = vadd.f32 %v2524_v30, %v1869_v16 }
 0x30a   : > { %1932 = vst.msk [vmem:[%s3238_s10 + $0x10] sm:$0xff] %vm1929_vm3, %v1915_v28 }
 0x30f   : > { %v1872_v33 = vpop.xlane.xlu1 %1871 }
 0x310   : > { %v1916_v56 = vadd.f32 %v2524_v30, %v1872_v33 }
 0x312   : > { %1933 = vst.msk [vmem:[%s3238_s10 + $0x18] sm:$0xff] %vm1929_vm3, %v1916_v56 }
 0x317   : > { %v1875_v23 = vpop.xlane.xlu2 %1874 }
 0x318   : > { %v1917_v62 = vadd.f32 %v2524_v30, %v1875_v23 }
 0x31a   : > { %1934 = vst.msk [vmem:[%s3238_s10 + $0x20] sm:$0xff] %vm1929_vm3, %v1917_v62 }
 0x31f   : > { %v1878_v50 = vpop.xlane.xlu2 %1877 }
 0x320   : > { %v1918_v51 = vadd.f32 %v2524_v30, %v1878_v50 }
 0x322   : > { %1935 = vst.msk [vmem:[%s3238_s10 + $0x28] sm:$0xff] %vm1929_vm3, %v1918_v51 }
 0x327   : > { %v1881_v21 = vpop.xlane.xlu0 %1880 }
 0x328   : > { %v1919_v20 = vadd.f32 %v2524_v30, %v1881_v21 }
 0x32a   : > { %1936 = vst.msk [vmem:[%s3238_s10 + $0x30] sm:$0xff] %vm1929_vm3, %v1919_v20 }
 0x32f   : > { %v1884_v7 = vpop.xlane.xlu1 %1883 }
 0x330   : > { %v1920_v10 = vadd.f32 %v2524_v30, %v1884_v7 }
 0x332   : > { %1937 = vst.msk [vmem:[%s3238_s10 + $0x38] sm:$0xff] %vm1929_vm3, %v1920_v10 }
 0x337   : > { %v1887_v41 = vpop.xlane.xlu2 %1886 }
 0x338   : > { %v1921_v47 = vadd.f32 %v2524_v30, %v1887_v41 }
 0x33a   : > { %1938 = vst.msk [vmem:[%s3238_s10 + $0x40] sm:$0xff] %vm1929_vm3, %v1921_v47 }
 0x33f   : > { %v1890_v52 = vpop.xlane.xlu0 %1889 }
 0x340   : > { %v1922_v32 = vadd.f32 %v2524_v30, %v1890_v52 }
 0x342   : > { %1939 = vst.msk [vmem:[%s3238_s10 + $0x48] sm:$0xff] %vm1929_vm3, %v1922_v32 }
 0x347   : > { %v1893_v45 = vpop.xlane.xlu1 %1892 }
 0x348   : > { %v1923_v34 = vadd.f32 %v2524_v30, %v1893_v45 }
 0x34a   : > { %1940 = vst.msk [vmem:[%s3238_s10 + $0x50] sm:$0xff] %vm1929_vm3, %v1923_v34 }
 0x34f   : > { %v1896_v38 = vpop.xlane.xlu2 %1895 }
 0x350   : > { %v1924_v17 = vadd.f32 %v2524_v30, %v1896_v38 }
 0x352   : > { %1941 = vst.msk [vmem:[%s3238_s10 + $0x58] sm:$0xff] %vm1929_vm3, %v1924_v17 }
 0x357   : > { %v1899_v31 = vpop.xlane.xlu0 %1898 }
 0x358   : > { %v1925_v36 = vadd.f32 %v2524_v30, %v1899_v31 }
 0x35a   : > { %1942 = vst.msk [vmem:[%s3238_s10 + $0x60] sm:$0xff] %vm1929_vm3, %v1925_v36 }
 0x35f   : > { %v1902_v18 = vpop.xlane.xlu1 %1901 }
 0x360   : > { %v1926_v35 = vadd.f32 %v2524_v30, %v1902_v18 }
 0x362   : > { %1943 = vst.msk [vmem:[%s3238_s10 + $0x68] sm:$0xff] %vm1929_vm3, %v1926_v35 }
 0x367   : > { %v1905_v59 = vpop.xlane.xlu2 %1904 }
 0x368   : > { %v1927_v63 = vadd.f32 %v2524_v30, %v1905_v59 }
 0x36a   : > { %1944 = vst.msk [vmem:[%s3238_s10 + $0x70] sm:$0xff] %vm1929_vm3, %v1927_v63 }
 0x36f   : > { %v1908_v49 = vpop.xlane.xlu0 %1907 }
 0x370   : > { %v1928_v19 = vadd.f32 %v2524_v30, %v1908_v49 }
 0x372   : > { %1945 = vst.msk [vmem:[%s3238_s10 + $0x78] sm:$0xff] %vm1929_vm3, %v1928_v19 }
 0x373 PF: > { %s22_s11 = sadd.s32 1, %s2565_s11  }
 0x374   : > { %p19_p7 = scmp.ge.s32.totalorder %s22_s11, 4  }
 0x376   :  { %21 = sbr.rel (!%p19_p7) target bundleno = 4 (0x4), region = 91 }
 0x37b   :  { %1968 = vsyncpa [#allocation4], 1 }
 0x37c   :  { %1970 = vsyncpa [#allocation4 + $0x1], 1 }

</bundles_post_ra>
